<compile_context>
chip_gen: v7x
topology: tpu7x:2x2x1
jax: 0.10.0
libtpu: 0.0.40
codegen_flags: <defaults>
</compile_context>

<pallas_src>
import jax
import jax.numpy as jnp
from jax.experimental import pallas as pl
from jax.experimental.pallas import tpu as pltpu

C_IN = 48
C_OUT = 1152
H = W = 7
HW = H * W


def se_gate_kernel(w_ref, s_ref, x_ref, o_ref):
    # w_ref: [Cout, Cin+1]  (1x1-conv weight with bias folded in as last column)
    # s_ref: [Cin+1, 1]     (squeeze vector with trailing 1.0)
    # x_ref / o_ref: [Cout, HW]
    z = jnp.dot(w_ref[...], s_ref[...],
                preferred_element_type=jnp.float32)          # [Cout, 1], f32 acc
    gate = jax.nn.sigmoid(z)                                 # [Cout, 1], f32 (EUP)
    # Channels sit on sublanes for both gate and x -> pure lane-broadcast mul.
    o_ref[...] = (gate * x_ref[...].astype(jnp.float32)).astype(o_ref.dtype)


def se_gate(x237, x234, weight, bias):
    """x237: [1, Cin, 1, 1]; x234: [1, Cout, H, W];
    weight: [Cout, Cin, 1, 1]; bias: [Cout]."""
    assert x237.shape == (1, C_IN, 1, 1)
    assert x234.shape == (1, C_OUT, H, W)
    out_dtype = x234.dtype

    # --- one-time parameter prep (precomputed / folded in a real model) ------
    w2 = weight.reshape(C_OUT, C_IN)
    w_aug = jnp.concatenate([w2, bias.reshape(C_OUT, 1)], axis=1)    # [Cout, Cin+1]

    # --- per-call activation prep (pure reshapes, no transposes/casts) -------
    s = x237.reshape(C_IN, 1)
    s_aug = jnp.concatenate([s, jnp.ones((1, 1), s.dtype)], axis=0)  # [Cin+1, 1]
    x2 = x234.reshape(C_OUT, HW)                                     # [Cout, HW]

    out2 = pl.pallas_call(
        se_gate_kernel,
        out_shape=jax.ShapeDtypeStruct((C_OUT, HW), out_dtype),
        grid=(1,),
        in_specs=[
            pl.BlockSpec((C_OUT, C_IN + 1), lambda i: (0, 0)),
            pl.BlockSpec((C_IN + 1, 1), lambda i: (0, 0)),
            pl.BlockSpec((C_OUT, HW), lambda i: (0, 0)),
        ],
        out_specs=pl.BlockSpec((C_OUT, HW), lambda i: (0, 0)),
        compiler_params=pltpu.CompilerParams(
            dimension_semantics=("arbitrary",)),
    )(w_aug, s_aug, x2)

    return out2.reshape(1, C_OUT, H, W)


if __name__ == "__main__":
    key = jax.random.PRNGKey(0)
    k1, k2, k3, k4 = jax.random.split(key, 4)

    # Deterministic "parameters" (shapes from Conv2d(48, 1152, kernel_size=(1,1)))
    weight = jax.random.normal(k1, (C_OUT, C_IN, 1, 1), jnp.float32) * 0.05
    bias = jax.random.normal(k2, (C_OUT,), jnp.float32) * 0.05

    # Inputs matching the module's forward signature
    x237 = jax.random.normal(k3, (1, C_IN, 1, 1), jnp.float32)
    x234 = jax.random.normal(k4, (1, C_OUT, H, W), jnp.float32)

    fn = jax.jit(se_gate)
    out = fn(x237, x234, weight, bias)
    out = jax.block_until_ready(out)

    # Pure-JAX reference check of the same semantics
    z_ref = jnp.einsum("oi,i->o", weight.reshape(C_OUT, C_IN),
                       x237.reshape(C_IN)) + bias
    ref = jax.nn.sigmoid(z_ref).reshape(1, C_OUT, 1, 1) * x234
    assert out.shape == (1, C_OUT, H, W)
    assert out.dtype == x234.dtype
    assert jnp.allclose(out, ref, atol=1e-5, rtol=1e-5)

    print("KERNEL_OK")
</pallas_src>

<mosaic_0001>
module attributes {stable_mosaic.version = 11 : i64} {
  func.func @se_gate_kernel(%arg0: i32, %arg1: memref<1152x49xf32, #tpu.memory_space<vmem>>, %arg2: memref<49x1xf32, #tpu.memory_space<vmem>>, %arg3: memref<1152x49xf32, #tpu.memory_space<vmem>>, %arg4: memref<1152x49xf32, #tpu.memory_space<vmem>>) attributes {dimension_semantics = [#tpu.dimension_semantics<arbitrary>], iteration_bounds = array<i64: 1>, scalar_prefetch = 0 : i64, scratch_operands = 0 : i64, tpu.core_type = #tpu.core_type<tc>, window_params = [{pipeline_mode = #tpu.pipeline_mode<synchronous>, transform_indices = @transform_0, window_bounds = array<i64: 1152, 49>}, {pipeline_mode = #tpu.pipeline_mode<synchronous>, transform_indices = @transform_1, window_bounds = array<i64: 49, 1>}, {pipeline_mode = #tpu.pipeline_mode<synchronous>, transform_indices = @transform_2, window_bounds = array<i64: 1152, 49>}, {pipeline_mode = #tpu.pipeline_mode<synchronous>, transform_indices = @transform_3, window_bounds = array<i64: 1152, 49>}]} {
    %c0 = arith.constant 0 : index
    %c0_0 = arith.constant 0 : index
    %0 = vector.load %arg1[%c0, %c0_0] : memref<1152x49xf32, #tpu.memory_space<vmem>>, vector<1152x49xf32>
    %c0_1 = arith.constant 0 : index
    %c0_2 = arith.constant 0 : index
    %1 = vector.load %arg2[%c0_1, %c0_2] : memref<49x1xf32, #tpu.memory_space<vmem>>, vector<49x1xf32>
    %cst = arith.constant dense<0.000000e+00> : vector<1152x1xf32>
    %2 = tpu.matmul %0, %1, %cst {dimension_numbers = #tpu.dot_dimension_numbers<[1], [0], [0], [1], [0, 0, 1, 1], [], []>} : vector<1152x49xf32>, vector<49x1xf32>, vector<1152x1xf32> -> vector<1152x1xf32>
    %3 = arith.negf %2 : vector<1152x1xf32>
    %4 = math.exp %3 : vector<1152x1xf32>
    %cst_3 = arith.constant 1.000000e+00 : f32
    %5 = vector.broadcast %cst_3 : f32 to vector<1152x1xf32>
    %6 = arith.addf %5, %4 : vector<1152x1xf32>
    %7 = arith.divf %5, %6 : vector<1152x1xf32>
    %c0_4 = arith.constant 0 : index
    %c0_5 = arith.constant 0 : index
    %8 = vector.load %arg3[%c0_4, %c0_5] : memref<1152x49xf32, #tpu.memory_space<vmem>>, vector<1152x49xf32>
    %9 = vector.broadcast %7 : vector<1152x1xf32> to vector<1152x49xf32>
    %10 = arith.mulf %9, %8 : vector<1152x49xf32>
    %c0_6 = arith.constant 0 : index
    %c0_7 = arith.constant 0 : index
    %11 = vector.load %arg4[%c0_6, %c0_7] : memref<1152x49xf32, #tpu.memory_space<vmem>>, vector<1152x49xf32>
    tpu.vector_store %arg4[%c0_6, %c0_7], %10 {strides = array<i32>} : memref<1152x49xf32, #tpu.memory_space<vmem>>, vector<1152x49xf32>,
    return
  }
  func.func @transform_0(%arg0: i32) -> (i32, i32) {
    %c0_i32 = arith.constant 0 : i32
    %c0_i32_0 = arith.constant 0 : i32
    %c0_i32_1 = arith.constant 0 : i32
    return %c0_i32, %c0_i32_0 : i32, i32
  }
  func.func @transform_1(%arg0: i32) -> (i32, i32) {
    %c0_i32 = arith.constant 0 : i32
    %c0_i32_0 = arith.constant 0 : i32
    %c0_i32_1 = arith.constant 0 : i32
    return %c0_i32, %c0_i32_0 : i32, i32
  }
  func.func @transform_2(%arg0: i32) -> (i32, i32) {
    %c0_i32 = arith.constant 0 : i32
    %c0_i32_0 = arith.constant 0 : i32
    %c0_i32_1 = arith.constant 0 : i32
    return %c0_i32, %c0_i32_0 : i32, i32
  }
  func.func @transform_3(%arg0: i32) -> (i32, i32) {
    %c0_i32 = arith.constant 0 : i32
    %c0_i32_0 = arith.constant 0 : i32
    %c0_i32_1 = arith.constant 0 : i32
    return %c0_i32, %c0_i32_0 : i32, i32
  }
}

</mosaic_0001>

<bundles_post_ra>
// kernel: se_gate.1
= control target key start
LH: loop header
LB: loop body
LE: loop exit
PB: predicated region body
PF: predicated region fallthrough
CT: control target
= control target key end

     0   :  { %vm165_vm0 = vcmask 400384   ;;  %vm598_vm1 = vcmask 1040384   ;;  %s6689_s1 = inlined_call_operand.vmem [shape: f32[49,1], index: 1, kind: input, shape index: {}]   ;;  %s6690_s0 = inlined_call_operand.vmem [shape: f32[1152,49], index: 0, kind: input, shape index: {}]   ;;  %s6691_s2 = inlined_call_operand.vmem [shape: f32[1152,49], index: 2, kind: input, shape index: {}]   ;;  %s6692_s3 = inlined_call_operand.vmem [shape: f32[1152,49], index: 3, kind: output, shape index: {}]  }
   0x1   :  { %v158_v0 = vld [vmem:[%s6689_s1] sm:$0xff]  ;;  %v159_v1 = vld [vmem:[%s6689_s1 + $0x8] sm:$0xff]  ;;  %v160_v2 = vld [vmem:[%s6689_s1 + $0x10] sm:$0xff] }
   0x2   :  { %v4077_v3 = vpack.c.bf16 %v159_v1, %v158_v0  ;;  %v161_v4 = vld [vmem:[%s6689_s1 + $0x18] sm:$0xff]  ;;  %v162_v6 = vld [vmem:[%s6689_s1 + $0x20] sm:$0xff]  ;;  %v163_v7 = vld [vmem:[%s6689_s1 + $0x28] sm:$0xff] }
   0x3   :  { %v4081_v5 = vpack.c.bf16 %v161_v4, %v160_v2  ;;  %v14_v8 = vld [vmem:[%s6690_s0] sm:$0xff]  ;;  %v4085_v10 = vpack.c.bf16 %v163_v7, %v162_v6  ;;  %v164_v11 = vld [vmem:[%s6689_s1 + $0x30] sm:$0x1]  ;;  %v15_v12 = vld [vmem:[%s6690_s0 + $0x8] sm:$0xff] }
   0x4   :  { %4078 = vmatprep.subr.bf16.mxu0 %v4077_v3  ;;  %4089 = vmatprep.subr.bf16.mxu1 %v4077_v3  ;;  %v86_v9 = vld [vmem:[%s6690_s0 + $0x240] sm:$0xff]  ;;  %v87_v13 = vld [vmem:[%s6690_s0 + $0x248] sm:$0xff]  ;;  %v16_v14 = vld [vmem:[%s6690_s0 + $0x10] sm:$0xff] }
   0x5   :  { %4080 = vmatpush3.bf16.msra.mxu0 %v4077_v3  ;;  %4093 = vmatpush3.bf16.msra.mxu1 %v4077_v3  ;;  %v88_v15 = vld [vmem:[%s6690_s0 + $0x250] sm:$0xff]  ;;  %v17_v16 = vld [vmem:[%s6690_s0 + $0x18] sm:$0xff]  ;;  %v18_v18 = vld [vmem:[%s6690_s0 + $0x20] sm:$0xff] }
   0x6   :  { %4082 = vmatprep.subr.bf16.mxu0 %v4081_v5  ;;  %4090 = vmatprep.subr.bf16.mxu1 %v4081_v5  ;;  %v89_v17 = vld [vmem:[%s6690_s0 + $0x258] sm:$0xff]  ;;  %v90_v19 = vld [vmem:[%s6690_s0 + $0x260] sm:$0xff]  ;;  %v19_v20 = vld [vmem:[%s6690_s0 + $0x28] sm:$0xff] }
   0x7   :  { %3861 = vmatprep.mubr.msk.f32.mxu0 %vm165_vm0, %v14_v8  ;;  %3969 = vmatprep.mubr.msk.f32.mxu1 %vm165_vm0, %v86_v9  ;;  %v91_v21 = vld [vmem:[%s6690_s0 + $0x268] sm:$0xff]  ;;  %v20_v22 = vld [vmem:[%s6690_s0 + $0x30] sm:$0xff]  ;;  %v21_v24 = vld [vmem:[%s6690_s0 + $0x38] sm:$0xff] }
   0x8   :  { %v92_v23 = vld [vmem:[%s6690_s0 + $0x270] sm:$0xff]  ;;  %v93_v25 = vld [vmem:[%s6690_s0 + $0x278] sm:$0xff]  ;;  %v22_v26 = vld [vmem:[%s6690_s0 + $0x40] sm:$0xff] }
   0x9   :  { %4084 = vmatpush3.bf16.msra.mxu0 %v4081_v5  ;;  %4094 = vmatpush3.bf16.msra.mxu1 %v4081_v5  ;;  %v94_v27 = vld [vmem:[%s6690_s0 + $0x280] sm:$0xff]  ;;  %v23_v28 = vld [vmem:[%s6690_s0 + $0x48] sm:$0xff]  ;;  %v24_v30 = vld [vmem:[%s6690_s0 + $0x50] sm:$0xff] }
   0xa   :  { %4086 = vmatprep.subr.bf16.mxu0 %v4085_v10  ;;  %4091 = vmatprep.subr.bf16.mxu1 %v4085_v10  ;;  %v95_v29 = vld [vmem:[%s6690_s0 + $0x288] sm:$0xff]  ;;  %v96_v31 = vld [vmem:[%s6690_s0 + $0x290] sm:$0xff]  ;;  %v25_v32 = vld [vmem:[%s6690_s0 + $0x58] sm:$0xff] }
   0xb   :  { %v97_v33 = vld [vmem:[%s6690_s0 + $0x298] sm:$0xff]  ;;  %v26_v34 = vld [vmem:[%s6690_s0 + $0x60] sm:$0xff]  ;;  %v27_v36 = vld [vmem:[%s6690_s0 + $0x68] sm:$0xff] }
   0xc   :  { %v98_v35 = vld [vmem:[%s6690_s0 + $0x2a0] sm:$0xff]  ;;  %v99_v37 = vld [vmem:[%s6690_s0 + $0x2a8] sm:$0xff]  ;;  %v28_v38 = vld [vmem:[%s6690_s0 + $0x70] sm:$0xff] }
   0xd   :  { %4088 = vmatpush3.bf16.msra.mxu0 %v4085_v10  ;;  %4095 = vmatpush3.bf16.msra.mxu1 %v4085_v10  ;;  %v100_v39 = vld [vmem:[%s6690_s0 + $0x2b0] sm:$0xff]  ;;  %v29_v40 = vld [vmem:[%s6690_s0 + $0x78] sm:$0xff]  ;;  %v30_v42 = vld [vmem:[%s6690_s0 + $0x80] sm:$0xff] }
   0xe   :  { %3859 = vmatprep.subr.msk.mxu0 %vm598_vm1, %v164_v11  ;;  %4092 = vmatprep.subr.msk.mxu1 %vm598_vm1, %v164_v11  ;;  %v101_v41 = vld [vmem:[%s6690_s0 + $0x2b8] sm:$0xff]  ;;  %v102_v43 = vld [vmem:[%s6690_s0 + $0x2c0] sm:$0xff]  ;;  %v31_v44 = vld [vmem:[%s6690_s0 + $0x88] sm:$0xff] }
   0xf   :  { %v103_v45 = vld [vmem:[%s6690_s0 + $0x2c8] sm:$0xff]  ;;  %v32_v46 = vld [vmem:[%s6690_s0 + $0x90] sm:$0xff]  ;;  %v33_v48 = vld [vmem:[%s6690_s0 + $0x98] sm:$0xff] }
  0x10   :  { %v104_v47 = vld [vmem:[%s6690_s0 + $0x2d0] sm:$0xff]  ;;  %v105_v49 = vld [vmem:[%s6690_s0 + $0x2d8] sm:$0xff]  ;;  %v34_v50 = vld [vmem:[%s6690_s0 + $0xa0] sm:$0xff] }
  0x11   :  { %3860 = vmatpush3.msk.msra.mxu0 %vm598_vm1, %v164_v11  ;;  %4096 = vmatpush3.msk.msra.mxu1 %vm598_vm1, %v164_v11  ;;  %v106_v51 = vld [vmem:[%s6690_s0 + $0x2e0] sm:$0xff]  ;;  %v35_v52 = vld [vmem:[%s6690_s0 + $0xa8] sm:$0xff]  ;;  %v36_v54 = vld [vmem:[%s6690_s0 + $0xb0] sm:$0xff] }
  0x12   :  { %3862 = vmatmul.mubr.msk.f32.vlgmr.msra.gmra.mrb[0].mxu0 %vm165_vm0, %v15_v12  ;;  %3970 = vmatmul.mubr.msk.f32.vlgmr.msra.gmra.mrb[0].mxu1 %vm165_vm0, %v87_v13  ;;  %v107_v53 = vld [vmem:[%s6690_s0 + $0x2e8] sm:$0xff]  ;;  %v108_v55 = vld [vmem:[%s6690_s0 + $0x2f0] sm:$0xff]  ;;  %v37_v56 = vld [vmem:[%s6690_s0 + $0xb8] sm:$0xff] }
  0x13   :  { %3864 = vmatprep.mubr.msk.f32.mxu0 %vm165_vm0, %v16_v14  ;;  %3972 = vmatprep.mubr.msk.f32.mxu1 %vm165_vm0, %v88_v15  ;;  %v109_v57 = vld [vmem:[%s6690_s0 + $0x2f8] sm:$0xff]  ;;  %v38_v58 = vld [vmem:[%s6690_s0 + $0xc0] sm:$0xff]  ;;  %v39_v60 = vld [vmem:[%s6690_s0 + $0xc8] sm:$0xff] }
  0x14   :  { %v110_v59 = vld [vmem:[%s6690_s0 + $0x300] sm:$0xff]  ;;  %v111_v61 = vld [vmem:[%s6690_s0 + $0x308] sm:$0xff]  ;;  %v40_v62 = vld [vmem:[%s6690_s0 + $0xd0] sm:$0xff] }
  0x15   :  { %v112_v63 = vld [vmem:[%s6690_s0 + $0x310] sm:$0xff]  ;;  %v41_v0 = vld [vmem:[%s6690_s0 + $0xd8] sm:$0xff]  ;;  %v42_v2 = vld [vmem:[%s6690_s0 + $0xe0] sm:$0xff] }
  0x16   :  { %3865 = vmatmul.mubr.msk.f32.gmra.mrb[2].mxu0 %vm165_vm0, %v17_v16  ;;  %3973 = vmatmul.mubr.msk.f32.gmra.mrb[2].mxu1 %vm165_vm0, %v89_v17  ;;  %v113_v1 = vld [vmem:[%s6690_s0 + $0x318] sm:$0xff]  ;;  %v114_v3 = vld [vmem:[%s6690_s0 + $0x320] sm:$0xff]  ;;  %v43_v4 = vld [vmem:[%s6690_s0 + $0xe8] sm:$0xff] }
  0x17   :  { %3867 = vmatprep.mubr.msk.f32.mxu0 %vm165_vm0, %v18_v18  ;;  %3975 = vmatprep.mubr.msk.f32.mxu1 %vm165_vm0, %v90_v19  ;;  %v115_v5 = vld [vmem:[%s6690_s0 + $0x328] sm:$0xff]  ;;  %v44_v6 = vld [vmem:[%s6690_s0 + $0xf0] sm:$0xff]  ;;  %v45_v8 = vld [vmem:[%s6690_s0 + $0xf8] sm:$0xff] }
  0x18   :  { %v116_v7 = vld [vmem:[%s6690_s0 + $0x330] sm:$0xff]  ;;  %v117_v9 = vld [vmem:[%s6690_s0 + $0x338] sm:$0xff]  ;;  %v46_v10 = vld [vmem:[%s6690_s0 + $0x100] sm:$0xff] }
  0x19   :  { %v118_v11 = vld [vmem:[%s6690_s0 + $0x340] sm:$0xff]  ;;  %v47_v12 = vld [vmem:[%s6690_s0 + $0x108] sm:$0xff]  ;;  %v48_v14 = vld [vmem:[%s6690_s0 + $0x110] sm:$0xff] }
  0x1a   :  { %3868 = vmatmul.mubr.msk.f32.gmra.mrb[4].mxu0 %vm165_vm0, %v19_v20  ;;  %3976 = vmatmul.mubr.msk.f32.gmra.mrb[4].mxu1 %vm165_vm0, %v91_v21  ;;  %v119_v13 = vld [vmem:[%s6690_s0 + $0x348] sm:$0xff]  ;;  %v120_v15 = vld [vmem:[%s6690_s0 + $0x350] sm:$0xff]  ;;  %v49_v16 = vld [vmem:[%s6690_s0 + $0x118] sm:$0xff] }
  0x1b   :  { %3870 = vmatprep.mubr.msk.f32.mxu0 %vm165_vm0, %v20_v22  ;;  %3978 = vmatprep.mubr.msk.f32.mxu1 %vm165_vm0, %v92_v23  ;;  %v121_v17 = vld [vmem:[%s6690_s0 + $0x358] sm:$0xff]  ;;  %v50_v18 = vld [vmem:[%s6690_s0 + $0x120] sm:$0xff]  ;;  %v51_v20 = vld [vmem:[%s6690_s0 + $0x128] sm:$0xff] }
  0x1c   :  { %v122_v19 = vld [vmem:[%s6690_s0 + $0x360] sm:$0xff]  ;;  %v123_v21 = vld [vmem:[%s6690_s0 + $0x368] sm:$0xff]  ;;  %v52_v22 = vld [vmem:[%s6690_s0 + $0x130] sm:$0xff] }
  0x1d   :  { %v124_v23 = vld [vmem:[%s6690_s0 + $0x370] sm:$0xff] }
  0x1e   :  { %3871 = vmatmul.mubr.msk.f32.gmra.mrb[6].mxu0 %vm165_vm0, %v21_v24  ;;  %3979 = vmatmul.mubr.msk.f32.gmra.mrb[6].mxu1 %vm165_vm0, %v93_v25  ;;  %v53_v24 = vld [vmem:[%s6690_s0 + $0x138] sm:$0xff] }
  0x1f   :  { %3873 = vmatprep.mubr.msk.f32.mxu0 %vm165_vm0, %v22_v26  ;;  %3981 = vmatprep.mubr.msk.f32.mxu1 %vm165_vm0, %v94_v27  ;;  %v125_v25 = vld [vmem:[%s6690_s0 + $0x378] sm:$0xff]  ;;  %v54_v26 = vld [vmem:[%s6690_s0 + $0x140] sm:$0xff] }
  0x20   :  { %v126_v27 = vld [vmem:[%s6690_s0 + $0x380] sm:$0xff] }
  0x22   :  { %3874 = vmatmul.mubr.msk.f32.gmra.mrb[8].mxu0 %vm165_vm0, %v23_v28  ;;  %3982 = vmatmul.mubr.msk.f32.gmra.mrb[8].mxu1 %vm165_vm0, %v95_v29  ;;  %v55_v28 = vld [vmem:[%s6690_s0 + $0x148] sm:$0xff] }
  0x23   :  { %3876 = vmatprep.mubr.msk.f32.mxu0 %vm165_vm0, %v24_v30  ;;  %3984 = vmatprep.mubr.msk.f32.mxu1 %vm165_vm0, %v96_v31  ;;  %v127_v29 = vld [vmem:[%s6690_s0 + $0x388] sm:$0xff]  ;;  %v56_v30 = vld [vmem:[%s6690_s0 + $0x150] sm:$0xff] }
  0x24   :  { %v128_v31 = vld [vmem:[%s6690_s0 + $0x390] sm:$0xff] }
  0x26   :  { %3877 = vmatmul.mubr.msk.f32.gmra.mrb[10].mxu0 %vm165_vm0, %v25_v32  ;;  %3985 = vmatmul.mubr.msk.f32.gmra.mrb[10].mxu1 %vm165_vm0, %v97_v33  ;;  %v57_v32 = vld [vmem:[%s6690_s0 + $0x158] sm:$0xff] }
  0x27   :  { %3879 = vmatprep.mubr.msk.f32.mxu0 %vm165_vm0, %v26_v34  ;;  %3987 = vmatprep.mubr.msk.f32.mxu1 %vm165_vm0, %v98_v35  ;;  %v129_v33 = vld [vmem:[%s6690_s0 + $0x398] sm:$0xff]  ;;  %v58_v34 = vld [vmem:[%s6690_s0 + $0x160] sm:$0xff] }
  0x28   :  { %v130_v35 = vld [vmem:[%s6690_s0 + $0x3a0] sm:$0xff] }
  0x2a   :  { %3880 = vmatmul.mubr.msk.f32.gmra.mrb[12].mxu0 %vm165_vm0, %v27_v36  ;;  %3988 = vmatmul.mubr.msk.f32.gmra.mrb[12].mxu1 %vm165_vm0, %v99_v37  ;;  %v59_v36 = vld [vmem:[%s6690_s0 + $0x168] sm:$0xff] }
  0x2b   :  { %3882 = vmatprep.mubr.msk.f32.mxu0 %vm165_vm0, %v28_v38  ;;  %3990 = vmatprep.mubr.msk.f32.mxu1 %vm165_vm0, %v100_v39  ;;  %v131_v37 = vld [vmem:[%s6690_s0 + $0x3a8] sm:$0xff]  ;;  %v60_v38 = vld [vmem:[%s6690_s0 + $0x170] sm:$0xff] }
  0x2c   :  { %v132_v39 = vld [vmem:[%s6690_s0 + $0x3b0] sm:$0xff] }
  0x2e   :  { %3883 = vmatmul.mubr.msk.f32.gmra.mrb[14].mxu0 %vm165_vm0, %v29_v40  ;;  %3991 = vmatmul.mubr.msk.f32.gmra.mrb[14].mxu1 %vm165_vm0, %v101_v41  ;;  %v61_v40 = vld [vmem:[%s6690_s0 + $0x178] sm:$0xff] }
  0x2f   :  { %3885 = vmatprep.mubr.msk.f32.mxu0 %vm165_vm0, %v30_v42  ;;  %3993 = vmatprep.mubr.msk.f32.mxu1 %vm165_vm0, %v102_v43  ;;  %v133_v41 = vld [vmem:[%s6690_s0 + $0x3b8] sm:$0xff]  ;;  %v62_v42 = vld [vmem:[%s6690_s0 + $0x180] sm:$0xff] }
  0x30   :  { %v134_v43 = vld [vmem:[%s6690_s0 + $0x3c0] sm:$0xff] }
  0x32   :  { %3886 = vmatmul.mubr.msk.f32.gmra.mrb[16].mxu0 %vm165_vm0, %v31_v44  ;;  %3994 = vmatmul.mubr.msk.f32.gmra.mrb[16].mxu1 %vm165_vm0, %v103_v45  ;;  %v63_v44 = vld [vmem:[%s6690_s0 + $0x188] sm:$0xff] }
  0x33   :  { %3888 = vmatprep.mubr.msk.f32.mxu0 %vm165_vm0, %v32_v46  ;;  %3996 = vmatprep.mubr.msk.f32.mxu1 %vm165_vm0, %v104_v47  ;;  %v135_v45 = vld [vmem:[%s6690_s0 + $0x3c8] sm:$0xff]  ;;  %v64_v46 = vld [vmem:[%s6690_s0 + $0x190] sm:$0xff] }
  0x34   :  { %v136_v47 = vld [vmem:[%s6690_s0 + $0x3d0] sm:$0xff] }
  0x36   :  { %3889 = vmatmul.mubr.msk.f32.gmra.mrb[18].mxu0 %vm165_vm0, %v33_v48  ;;  %3997 = vmatmul.mubr.msk.f32.gmra.mrb[18].mxu1 %vm165_vm0, %v105_v49  ;;  %v65_v48 = vld [vmem:[%s6690_s0 + $0x198] sm:$0xff] }
  0x37   :  { %3891 = vmatprep.mubr.msk.f32.mxu0 %vm165_vm0, %v34_v50  ;;  %3999 = vmatprep.mubr.msk.f32.mxu1 %vm165_vm0, %v106_v51  ;;  %v137_v49 = vld [vmem:[%s6690_s0 + $0x3d8] sm:$0xff]  ;;  %v66_v50 = vld [vmem:[%s6690_s0 + $0x1a0] sm:$0xff] }
  0x38   :  { %v138_v51 = vld [vmem:[%s6690_s0 + $0x3e0] sm:$0xff] }
  0x3a   :  { %3892 = vmatmul.mubr.msk.f32.gmra.mrb[20].mxu0 %vm165_vm0, %v35_v52  ;;  %4000 = vmatmul.mubr.msk.f32.gmra.mrb[20].mxu1 %vm165_vm0, %v107_v53  ;;  %v67_v52 = vld [vmem:[%s6690_s0 + $0x1a8] sm:$0xff] }
  0x3b   :  { %3894 = vmatprep.mubr.msk.f32.mxu0 %vm165_vm0, %v36_v54  ;;  %4002 = vmatprep.mubr.msk.f32.mxu1 %vm165_vm0, %v108_v55  ;;  %v139_v53 = vld [vmem:[%s6690_s0 + $0x3e8] sm:$0xff]  ;;  %v68_v54 = vld [vmem:[%s6690_s0 + $0x1b0] sm:$0xff] }
  0x3c   :  { %v140_v55 = vld [vmem:[%s6690_s0 + $0x3f0] sm:$0xff] }
  0x3e   :  { %3895 = vmatmul.mubr.msk.f32.gmra.mrb[22].mxu0 %vm165_vm0, %v37_v56  ;;  %4003 = vmatmul.mubr.msk.f32.gmra.mrb[22].mxu1 %vm165_vm0, %v109_v57  ;;  %v69_v56 = vld [vmem:[%s6690_s0 + $0x1b8] sm:$0xff] }
  0x3f   :  { %3897 = vmatprep.mubr.msk.f32.mxu0 %vm165_vm0, %v38_v58  ;;  %4005 = vmatprep.mubr.msk.f32.mxu1 %vm165_vm0, %v110_v59  ;;  %v141_v57 = vld [vmem:[%s6690_s0 + $0x3f8] sm:$0xff]  ;;  %v70_v58 = vld [vmem:[%s6690_s0 + $0x1c0] sm:$0xff] }
  0x40   :  { %v142_v59 = vld [vmem:[%s6690_s0 + $0x400] sm:$0xff] }
  0x42   :  { %3898 = vmatmul.mubr.msk.f32.gmra.mrb[24].mxu0 %vm165_vm0, %v39_v60  ;;  %4006 = vmatmul.mubr.msk.f32.gmra.mrb[24].mxu1 %vm165_vm0, %v111_v61  ;;  %v71_v60 = vld [vmem:[%s6690_s0 + $0x1c8] sm:$0xff] }
  0x43   :  { %3900 = vmatprep.mubr.msk.f32.mxu0 %vm165_vm0, %v40_v62  ;;  %4008 = vmatprep.mubr.msk.f32.mxu1 %vm165_vm0, %v112_v63  ;;  %v143_v61 = vld [vmem:[%s6690_s0 + $0x408] sm:$0xff]  ;;  %v72_v62 = vld [vmem:[%s6690_s0 + $0x1d0] sm:$0xff] }
  0x44   :  { %v144_v63 = vld [vmem:[%s6690_s0 + $0x410] sm:$0xff] }
  0x46   :  { %3901 = vmatmul.mubr.msk.f32.gmra.mrb[26].mxu0 %vm165_vm0, %v41_v0  ;;  %4009 = vmatmul.mubr.msk.f32.gmra.mrb[26].mxu1 %vm165_vm0, %v113_v1  ;;  %v73_v0 = vld [vmem:[%s6690_s0 + $0x1d8] sm:$0xff] }
  0x47   :  { %3903 = vmatprep.mubr.msk.f32.mxu0 %vm165_vm0, %v42_v2  ;;  %4011 = vmatprep.mubr.msk.f32.mxu1 %vm165_vm0, %v114_v3  ;;  %v145_v1 = vld [vmem:[%s6690_s0 + $0x418] sm:$0xff]  ;;  %v4676_v2 = vmov 0   ;;  %v74_v3 = vld [vmem:[%s6690_s0 + $0x1e0] sm:$0xff] }
  0x48   :  { %4099 = vset.pattern.permute.xlu1 %v4676_v2  ;;  %4098 = vset.pattern.permute.xlu0 %v4676_v2 }
  0x4a   :  { %3904 = vmatmul.mubr.msk.f32.gmra.mrb[28].mxu0 %vm165_vm0, %v43_v4  ;;  %4012 = vmatmul.mubr.msk.f32.gmra.mrb[28].mxu1 %vm165_vm0, %v115_v5  ;;  %v146_v4 = vld [vmem:[%s6690_s0 + $0x420] sm:$0xff]  ;;  %v75_v5 = vld [vmem:[%s6690_s0 + $0x1e8] sm:$0xff] }
  0x4b   :  { %3906 = vmatprep.mubr.msk.f32.mxu0 %vm165_vm0, %v44_v6  ;;  %4014 = vmatprep.mubr.msk.f32.mxu1 %vm165_vm0, %v116_v7  ;;  %v147_v6 = vld [vmem:[%s6690_s0 + $0x428] sm:$0xff]  ;;  %v76_v7 = vld [vmem:[%s6690_s0 + $0x1f0] sm:$0xff] }
  0x4e   :  { %3907 = vmatmul.mubr.msk.f32.gmra.mrb[30].mxu0 %vm165_vm0, %v45_v8  ;;  %4015 = vmatmul.mubr.msk.f32.gmra.mrb[30].mxu1 %vm165_vm0, %v117_v9  ;;  %v77_v8 = vld [vmem:[%s6690_s0 + $0x1f8] sm:$0xff]  ;;  %v148_v9 = vld [vmem:[%s6690_s0 + $0x430] sm:$0xff] }
  0x4f   :  { %3909 = vmatprep.mubr.msk.f32.mxu0 %vm165_vm0, %v46_v10  ;;  %4017 = vmatprep.mubr.msk.f32.mxu1 %vm165_vm0, %v118_v11  ;;  %v149_v10 = vld [vmem:[%s6690_s0 + $0x438] sm:$0xff]  ;;  %v78_v11 = vld [vmem:[%s6690_s0 + $0x200] sm:$0xff] }
  0x52   :  { %3910 = vmatmul.mubr.msk.f32.gmra.mrb[32].mxu0 %vm165_vm0, %v47_v12  ;;  %4018 = vmatmul.mubr.msk.f32.gmra.mrb[32].mxu1 %vm165_vm0, %v119_v13  ;;  %v79_v12 = vld [vmem:[%s6690_s0 + $0x208] sm:$0xff]  ;;  %v150_v13 = vld [vmem:[%s6690_s0 + $0x440] sm:$0xff] }
  0x53   :  { %3912 = vmatprep.mubr.msk.f32.mxu0 %vm165_vm0, %v48_v14  ;;  %4020 = vmatprep.mubr.msk.f32.mxu1 %vm165_vm0, %v120_v15  ;;  %v151_v14 = vld [vmem:[%s6690_s0 + $0x448] sm:$0xff]  ;;  %v80_v15 = vld [vmem:[%s6690_s0 + $0x210] sm:$0xff] }
  0x56   :  { %3913 = vmatmul.mubr.msk.f32.gmra.mrb[34].mxu0 %vm165_vm0, %v49_v16  ;;  %4021 = vmatmul.mubr.msk.f32.gmra.mrb[34].mxu1 %vm165_vm0, %v121_v17  ;;  %v81_v16 = vld [vmem:[%s6690_s0 + $0x218] sm:$0xff]  ;;  %v152_v17 = vld [vmem:[%s6690_s0 + $0x450] sm:$0xff] }
  0x57   :  { %3915 = vmatprep.mubr.msk.f32.mxu0 %vm165_vm0, %v50_v18  ;;  %4023 = vmatprep.mubr.msk.f32.mxu1 %vm165_vm0, %v122_v19  ;;  %v153_v18 = vld [vmem:[%s6690_s0 + $0x458] sm:$0xff]  ;;  %v82_v19 = vld [vmem:[%s6690_s0 + $0x220] sm:$0xff] }
  0x5a   :  { %3916 = vmatmul.mubr.msk.f32.gmra.mrb[36].mxu0 %vm165_vm0, %v51_v20  ;;  %4024 = vmatmul.mubr.msk.f32.gmra.mrb[36].mxu1 %vm165_vm0, %v123_v21  ;;  %v83_v20 = vld [vmem:[%s6690_s0 + $0x228] sm:$0xff]  ;;  %v154_v21 = vld [vmem:[%s6690_s0 + $0x460] sm:$0xff] }
  0x5b   :  { %3918 = vmatprep.mubr.msk.f32.mxu0 %vm165_vm0, %v52_v22  ;;  %4026 = vmatprep.mubr.msk.f32.mxu1 %vm165_vm0, %v124_v23  ;;  %v155_v22 = vld [vmem:[%s6690_s0 + $0x468] sm:$0xff]  ;;  %v84_v23 = vld [vmem:[%s6690_s0 + $0x230] sm:$0xff] }
  0x5e   :  { %3919 = vmatmul.mubr.msk.f32.gmra.mrb[38].mxu0 %vm165_vm0, %v53_v24  ;;  %4027 = vmatmul.mubr.msk.f32.gmra.mrb[38].mxu1 %vm165_vm0, %v125_v25  ;;  %v85_v24 = vld [vmem:[%s6690_s0 + $0x238] sm:$0xff]  ;;  %v156_v25 = vld [vmem:[%s6690_s0 + $0x470] sm:$0xff] }
  0x5f   :  { %3921 = vmatprep.mubr.msk.f32.mxu0 %vm165_vm0, %v54_v26  ;;  %4029 = vmatprep.mubr.msk.f32.mxu1 %vm165_vm0, %v126_v27  ;;  %v157_v26 = vld [vmem:[%s6690_s0 + $0x478] sm:$0xff] }
  0x62   :  { %3922 = vmatmul.mubr.msk.f32.gmra.mrb[40].mxu0 %vm165_vm0, %v55_v28  ;;  %4030 = vmatmul.mubr.msk.f32.gmra.mrb[40].mxu1 %vm165_vm0, %v127_v29 }
  0x63   :  { %3924 = vmatprep.mubr.msk.f32.mxu0 %vm165_vm0, %v56_v30  ;;  %4032 = vmatprep.mubr.msk.f32.mxu1 %vm165_vm0, %v128_v31 }
  0x66   :  { %3925 = vmatmul.mubr.msk.f32.gmra.mrb[42].mxu0 %vm165_vm0, %v57_v32  ;;  %4033 = vmatmul.mubr.msk.f32.gmra.mrb[42].mxu1 %vm165_vm0, %v129_v33 }
  0x67   :  { %3927 = vmatprep.mubr.msk.f32.mxu0 %vm165_vm0, %v58_v34  ;;  %4035 = vmatprep.mubr.msk.f32.mxu1 %vm165_vm0, %v130_v35 }
  0x6a   :  { %3928 = vmatmul.mubr.msk.f32.gmra.mrb[44].mxu0 %vm165_vm0, %v59_v36  ;;  %4036 = vmatmul.mubr.msk.f32.gmra.mrb[44].mxu1 %vm165_vm0, %v131_v37 }
  0x6b   :  { %3930 = vmatprep.mubr.msk.f32.mxu0 %vm165_vm0, %v60_v38  ;;  %4038 = vmatprep.mubr.msk.f32.mxu1 %vm165_vm0, %v132_v39 }
  0x6e   :  { %3931 = vmatmul.mubr.msk.f32.gmra.mrb[46].mxu0 %vm165_vm0, %v61_v40  ;;  %4039 = vmatmul.mubr.msk.f32.gmra.mrb[46].mxu1 %vm165_vm0, %v133_v41 }
  0x6f   :  { %3933 = vmatprep.mubr.msk.f32.mxu0 %vm165_vm0, %v62_v42  ;;  %4041 = vmatprep.mubr.msk.f32.mxu1 %vm165_vm0, %v134_v43 }
  0x72   :  { %3934 = vmatmul.mubr.msk.f32.gmra.mrb[48].mxu0 %vm165_vm0, %v63_v44  ;;  %4042 = vmatmul.mubr.msk.f32.gmra.mrb[48].mxu1 %vm165_vm0, %v135_v45 }
  0x73   :  { %3936 = vmatprep.mubr.msk.f32.mxu0 %vm165_vm0, %v64_v46  ;;  %4044 = vmatprep.mubr.msk.f32.mxu1 %vm165_vm0, %v136_v47 }
  0x76   :  { %3937 = vmatmul.mubr.msk.f32.gmra.mrb[50].mxu0 %vm165_vm0, %v65_v48  ;;  %4045 = vmatmul.mubr.msk.f32.gmra.mrb[50].mxu1 %vm165_vm0, %v137_v49 }
  0x77   :  { %3939 = vmatprep.mubr.msk.f32.mxu0 %vm165_vm0, %v66_v50  ;;  %4047 = vmatprep.mubr.msk.f32.mxu1 %vm165_vm0, %v138_v51 }
  0x7a   :  { %3940 = vmatmul.mubr.msk.f32.gmra.mrb[52].mxu0 %vm165_vm0, %v67_v52  ;;  %4048 = vmatmul.mubr.msk.f32.gmra.mrb[52].mxu1 %vm165_vm0, %v139_v53 }
  0x7b   :  { %3942 = vmatprep.mubr.msk.f32.mxu0 %vm165_vm0, %v68_v54  ;;  %4050 = vmatprep.mubr.msk.f32.mxu1 %vm165_vm0, %v140_v55 }
  0x7e   :  { %3943 = vmatmul.mubr.msk.f32.gmra.mrb[54].mxu0 %vm165_vm0, %v69_v56  ;;  %4051 = vmatmul.mubr.msk.f32.gmra.mrb[54].mxu1 %vm165_vm0, %v141_v57 }
  0x7f   :  { %3945 = vmatprep.mubr.msk.f32.mxu0 %vm165_vm0, %v70_v58  ;;  %4053 = vmatprep.mubr.msk.f32.mxu1 %vm165_vm0, %v142_v59 }
  0x82   :  { %3946 = vmatmul.mubr.msk.f32.gmra.mrb[56].mxu0 %vm165_vm0, %v71_v60  ;;  %4054 = vmatmul.mubr.msk.f32.gmra.mrb[56].mxu1 %vm165_vm0, %v143_v61 }
  0x83   :  { %3948 = vmatprep.mubr.msk.f32.mxu0 %vm165_vm0, %v72_v62  ;;  %4056 = vmatprep.mubr.msk.f32.mxu1 %vm165_vm0, %v144_v63 }
  0x86   :  { %3949 = vmatmul.mubr.msk.f32.gmra.mrb[58].mxu0 %vm165_vm0, %v73_v0  ;;  %4057 = vmatmul.mubr.msk.f32.gmra.mrb[58].mxu1 %vm165_vm0, %v145_v1 }
  0x87   :  { %3951 = vmatprep.mubr.msk.f32.mxu0 %vm165_vm0, %v74_v3  ;;  %4059 = vmatprep.mubr.msk.f32.mxu1 %vm165_vm0, %v146_v4 }
  0x8a   :  { %3952 = vmatmul.mubr.msk.f32.gmra.mrb[60].mxu0 %vm165_vm0, %v75_v5  ;;  %4060 = vmatmul.mubr.msk.f32.gmra.mrb[60].mxu1 %vm165_vm0, %v147_v6 }
  0x8b   :  { %3954 = vmatprep.mubr.msk.f32.mxu0 %vm165_vm0, %v76_v7  ;;  %4062 = vmatprep.mubr.msk.f32.mxu1 %vm165_vm0, %v148_v9 }
  0x8e   :  { %3955 = vmatmul.mubr.msk.f32.gmra.mrb[62].mxu0 %vm165_vm0, %v77_v8  ;;  %4063 = vmatmul.mubr.msk.f32.gmra.mrb[62].mxu1 %vm165_vm0, %v149_v10 }
  0x8f   :  { %3957 = vmatprep.mubr.msk.f32.mxu0 %vm165_vm0, %v78_v11  ;;  %4065 = vmatprep.mubr.msk.f32.mxu1 %vm165_vm0, %v150_v13 }
  0x92   :  { %3958 = vmatmul.mubr.msk.f32.gmra.mrb[64].mxu0 %vm165_vm0, %v79_v12  ;;  %4066 = vmatmul.mubr.msk.f32.gmra.mrb[64].mxu1 %vm165_vm0, %v151_v14 }
  0x93   :  { %3960 = vmatprep.mubr.msk.f32.mxu0 %vm165_vm0, %v80_v15  ;;  %4068 = vmatprep.mubr.msk.f32.mxu1 %vm165_vm0, %v152_v17 }
  0x96   :  { %3961 = vmatmul.mubr.msk.f32.gmra.mrb[66].mxu0 %vm165_vm0, %v81_v16  ;;  %4069 = vmatmul.mubr.msk.f32.gmra.mrb[66].mxu1 %vm165_vm0, %v153_v18 }
  0x97   :  { %3963 = vmatprep.mubr.msk.f32.mxu0 %vm165_vm0, %v82_v19  ;;  %4071 = vmatprep.mubr.msk.f32.mxu1 %vm165_vm0, %v154_v21 }
  0x9a   :  { %3964 = vmatmul.mubr.msk.f32.gmra.mrb[68].mxu0 %vm165_vm0, %v83_v20  ;;  %4072 = vmatmul.mubr.msk.f32.gmra.mrb[68].mxu1 %vm165_vm0, %v155_v22 }
  0x9b   :  { %3966 = vmatprep.mubr.msk.f32.mxu0 %vm165_vm0, %v84_v23  ;;  %4074 = vmatprep.mubr.msk.f32.mxu1 %vm165_vm0, %v156_v25 }
  0x9e   :  { %3967 = vmatmul.mubr.msk.f32.gmra.mrb[70].mxu0 %vm165_vm0, %v85_v24  ;;  %4075 = vmatmul.mubr.msk.f32.gmra.mrb[70].mxu1 %vm165_vm0, %v157_v26 }
  0xe5   :  { %v3863_v27 = vpop.f32.mrb[0].mxu0  ;;  %v3971_v28 = vpop.f32.mrb[0].mxu1 }
  0xe6   :  { %v3553_v29 = vmul.f32 -1.442695, %v3863_v27  ;;  %v3625_v30 = vmul.f32 -1.442695, %v3971_v28  ;;  %v668_v31 = vpop.f32.mrb[1].mxu0  ;;  %v1028_v32 = vpop.f32.mrb[1].mxu1 }
  0xe7   :  { %v3552_v33 = vmul.f32 -1.442695, %v668_v31  ;;  %v3624_v34 = vmul.f32 -1.442695, %v1028_v32 }
  0xe8   :  { %4100 = vpow2.f32 %v3553_v29 }
  0xe9   :  { %4102 = vpow2.f32 %v3625_v30  ;;  %v3866_v35 = vpop.f32.mrb[2].mxu0  ;;  %v3974_v36 = vpop.f32.mrb[2].mxu1 }
  0xea   :  { %4104 = vpow2.f32 %v3552_v33  ;;  %v3555_v37 = vmul.f32 -1.442695, %v3866_v35  ;;  %v678_v38 = vpop.f32.mrb[3].mxu0  ;;  %v3627_v39 = vmul.f32 -1.442695, %v3974_v36  ;;  %v1038_v40 = vpop.f32.mrb[3].mxu1 }
  0xeb   :  { %4106 = vpow2.f32 %v3624_v34  ;;  %v3554_v41 = vmul.f32 -1.442695, %v678_v38  ;;  %v3626_v42 = vmul.f32 -1.442695, %v1038_v40 }
  0xec   :  { %4108 = vpow2.f32 %v3555_v37 }
  0xed   :  { %4110 = vpow2.f32 %v3554_v41  ;;  %v3869_v43 = vpop.f32.mrb[4].mxu0  ;;  %v3977_v44 = vpop.f32.mrb[4].mxu1 }
  0xee   :  { %4112 = vpow2.f32 %v3627_v39  ;;  %v3557_v45 = vmul.f32 -1.442695, %v3869_v43  ;;  %v688_v46 = vpop.f32.mrb[5].mxu0  ;;  %v3629_v47 = vmul.f32 -1.442695, %v3977_v44  ;;  %v1048_v48 = vpop.f32.mrb[5].mxu1 }
  0xef   :  { %4114 = vpow2.f32 %v3626_v42  ;;  %v3556_v49 = vmul.f32 -1.442695, %v688_v46  ;;  %v3628_v50 = vmul.f32 -1.442695, %v1048_v48 }
  0xf0   :  { %4116 = vpow2.f32 %v3557_v45 }
  0xf1   :  { %4118 = vpow2.f32 %v3556_v49  ;;  %v3872_v51 = vpop.f32.mrb[6].mxu0  ;;  %v3980_v52 = vpop.f32.mrb[6].mxu1 }
  0xf2   :  { %v4101_v53 = vpop.eup %4100  ;;  %4120 = vpow2.f32 %v3629_v47  ;;  %v3559_v54 = vmul.f32 -1.442695, %v3872_v51  ;;  %v698_v55 = vpop.f32.mrb[7].mxu0  ;;  %v3631_v31 = vmul.f32 -1.442695, %v3980_v52 }
  0xf3   :  { %v1058_v56 = vpop.f32.mrb[7].mxu1  ;;  %v4103_v57 = vpop.eup %4102  ;;  %v1820_v58 = vadd.f32 1.0, %v4101_v53  ;;  %4122 = vpow2.f32 %v3628_v50  ;;  %v3558_v27 = vmul.f32 -1.442695, %v698_v55 }
  0xf4   :  { %v4105_v59 = vpop.eup %4104  ;;  %v1892_v60 = vadd.f32 1.0, %v4103_v57  ;;  %4124 = vpow2.f32 %v3559_v54  ;;  %v3630_v34 = vmul.f32 -1.442695, %v1058_v56 }
  0xf5   :  { %v4107_v61 = vpop.eup %4106  ;;  %4126 = vrcp.f32 %v1820_v58  ;;  %v1819_v62 = vadd.f32 1.0, %v4105_v59  ;;  %v3875_v63 = vpop.f32.mrb[8].mxu0 }
  0xf6   :  { %v3983_v0 = vpop.f32.mrb[8].mxu1  ;;  %v4109_v1 = vpop.eup %4108  ;;  %4128 = vrcp.f32 %v1892_v60  ;;  %v1891_v2 = vadd.f32 1.0, %v4107_v61  ;;  %v3561_v36 = vmul.f32 -1.442695, %v3875_v63 }
  0xf7   :  { %v708_v3 = vpop.f32.mrb[9].mxu0  ;;  %v4111_v4 = vpop.eup %4110  ;;  %4130 = vrcp.f32 %v1819_v62  ;;  %v1822_v5 = vadd.f32 1.0, %v4109_v1  ;;  %v3633_v44 = vmul.f32 -1.442695, %v3983_v0 }
  0xf8   :  { %v1068_v6 = vpop.f32.mrb[9].mxu1  ;;  %v4113_v7 = vpop.eup %4112  ;;  %4132 = vrcp.f32 %v1891_v2  ;;  %v1821_v8 = vadd.f32 1.0, %v4111_v4  ;;  %v3560_v40 = vmul.f32 -1.442695, %v708_v3 }
  0xf9   :  { %v4115_v9 = vpop.eup %4114  ;;  %4134 = vrcp.f32 %v1822_v5  ;;  %v1894_v10 = vadd.f32 1.0, %v4113_v7  ;;  %v3878_v11 = vpop.f32.mrb[10].mxu0  ;;  %v3632_v46 = vmul.f32 -1.442695, %v1068_v6 }
  0xfa   :  { %v3986_v12 = vpop.f32.mrb[10].mxu1  ;;  %v4117_v13 = vpop.eup %4116  ;;  %4136 = vrcp.f32 %v1821_v8  ;;  %v1893_v14 = vadd.f32 1.0, %v4115_v9  ;;  %v3563_v48 = vmul.f32 -1.442695, %v3878_v11 }
  0xfb   :  { %v718_v15 = vpop.f32.mrb[11].mxu0  ;;  %v4119_v16 = vpop.eup %4118  ;;  %4138 = vrcp.f32 %v1894_v10  ;;  %v1824_v17 = vadd.f32 1.0, %v4117_v13  ;;  %v3635_v56 = vmul.f32 -1.442695, %v3986_v12 }
  0xfc   :  { %v1078_v18 = vpop.f32.mrb[11].mxu1  ;;  %v4121_v19 = vpop.eup %4120  ;;  %4140 = vrcp.f32 %v1893_v14  ;;  %v1823_v20 = vadd.f32 1.0, %v4119_v16  ;;  %v3562_v52 = vmul.f32 -1.442695, %v718_v15 }
  0xfd   :  { %v4123_v21 = vpop.eup %4122  ;;  %4142 = vrcp.f32 %v1824_v17  ;;  %v1896_v22 = vadd.f32 1.0, %v4121_v19  ;;  %v3881_v23 = vpop.f32.mrb[12].mxu0  ;;  %v3634_v58 = vmul.f32 -1.442695, %v1078_v18 }
  0xfe   :  { %v5294_v24 = vpop.f32.mrb[12].mxu1  ;;  %v4125_v25 = vpop.eup %4124  ;;  %4144 = vrcp.f32 %v1823_v20  ;;  %v1895_v26 = vadd.f32 1.0, %v4123_v21  ;;  %v3565_v60 = vmul.f32 -1.442695, %v3881_v23 }
  0xff   :  { %v728_v28 = vpop.f32.mrb[13].mxu0  ;;  %v4127_v29 = vpop.eup %4126  ;;  %4146 = vrcp.f32 %v1896_v22  ;;  %v1826_v30 = vadd.f32 1.0, %v4125_v25 }
 0x100   :  { %v5296_v32 = vpop.f32.mrb[13].mxu1  ;;  %v4129_v33 = vpop.eup %4128  ;;  %4148 = vrcp.f32 %v1895_v26  ;;  %2402 = vperm.xlu0 %4098, %v4127_v29   ;;  %v3564_v0 = vmul.f32 -1.442695, %v728_v28 }
 0x101   :  { %v4131_v35 = vpop.eup %4130  ;;  %4150 = vrcp.f32 %v1826_v30  ;;  %2762 = vperm.xlu1 %4099, %v4129_v33   ;;  %v5298_v37 = vpop.f32.mrb[14].mxu0 }
 0x102   :  { %v5300_v38 = vpop.f32.mrb[14].mxu1  ;;  %v4133_v39 = vpop.eup %4132  ;;  %4152 = vpow2.f32 %v3558_v27 }
 0x103   :  { %v5302_v41 = vpop.f32.mrb[15].mxu0  ;;  %v5304_v42 = vpop.f32.mrb[15].mxu1  ;;  %4154 = vpow2.f32 %v3631_v31 }
 0x104   :  { %v4135_v43 = vpop.eup %4134  ;;  %4156 = vpow2.f32 %v3630_v34  ;;  %2397 = vperm.xlu0 %4098, %v4131_v35  }
 0x105   :  { %v4137_v45 = vpop.eup %4136  ;;  %4158 = vpow2.f32 %v3561_v36  ;;  %2412 = vperm.xlu1 %4099, %v4135_v43   ;;  %v5306_v49 = vpop.f32.mrb[16].mxu0 }
 0x106   :  { %v4139_v47 = vpop.eup %4138  ;;  %v5308_v50 = vpop.f32.mrb[16].mxu1  ;;  %4160 = vpow2.f32 %v3560_v40 }
 0x107   :  { %v4141_v51 = vpop.eup %4140  ;;  %v5310_v53 = vpop.f32.mrb[17].mxu0  ;;  %4162 = vpow2.f32 %v3633_v44 }
 0x108   :  { %v5312_v54 = vpop.f32.mrb[17].mxu1  ;;  %v4143_v55 = vpop.eup %4142  ;;  %4164 = vpow2.f32 %v3632_v46  ;;  %2757 = vperm.xlu0 %4098, %v4133_v39  }
 0x109   :  { %v4145_v57 = vpop.eup %4144  ;;  %2772 = vperm.xlu1 %4099, %v4139_v47   ;;  %4166 = vpow2.f32 %v3563_v48  ;;  %v5314_v61 = vpop.f32.mrb[18].mxu0  ;;  %v3637_v47 = vmul.f32 -1.442695, %v5294_v24 }
 0x10a   :  { %v4147_v59 = vpop.eup %4146  ;;  %v5316_v62 = vpop.f32.mrb[18].mxu1  ;;  %4168 = vpow2.f32 %v3562_v52  ;;  %v3636_v52 = vmul.f32 -1.442695, %v5296_v32  ;;  %v3639_v32 = vmul.f32 -1.442695, %v5300_v38 }
 0x10b   :  { %v4149_v63 = vpop.eup %4148  ;;  %v5318_v1 = vpop.f32.mrb[19].mxu0  ;;  %4170 = vpow2.f32 %v3635_v56  ;;  %v3568_v38 = vmul.f32 -1.442695, %v5310_v53 }
 0x10c   :  { %v5320_v2 = vpop.f32.mrb[19].mxu1  ;;  %v4151_v3 = vpop.eup %4150  ;;  %2767 = vperm.xlu0 %4098, %v4141_v51   ;;  %4172 = vpow2.f32 %v3634_v58  ;;  %v3567_v58 = vmul.f32 -1.442695, %v5298_v37 }
 0x10d   :  { %v4153_v4 = vpop.eup %4152  ;;  %2407 = vperm.xlu1 %4099, %v4137_v45   ;;  %4174 = vpow2.f32 %v3565_v60  ;;  %v5322_v7 = vpop.f32.mrb[20].mxu0 }
 0x10e   :  { %v4155_v5 = vpop.eup %4154  ;;  %v1825_v6 = vadd.f32 1.0, %v4153_v4  ;;  %v5324_v8 = vpop.f32.mrb[20].mxu1  ;;  %4176 = vpow2.f32 %v3564_v0  ;;  %v3638_v4 = vmul.f32 -1.442695, %v5304_v42  ;;  %v3641_v42 = vmul.f32 -1.442695, %v5308_v50 }
 0x10f   :  { %v4157_v9 = vpop.eup %4156  ;;  %v1898_v10 = vadd.f32 1.0, %v4155_v5  ;;  %v5326_v11 = vpop.f32.mrb[21].mxu0  ;;  %v3570_v50 = vmul.f32 -1.442695, %v5318_v1 }
 0x110   :  { %v4159_v12 = vpop.eup %4158  ;;  %4178 = vrcp.f32 %v1825_v6  ;;  %v1897_v13 = vadd.f32 1.0, %v4157_v9  ;;  %v5328_v14 = vpop.f32.mrb[21].mxu1  ;;  %2417 = vperm.xlu0 %4098, %v4145_v57   ;;  %v3569_v9 = vmul.f32 -1.442695, %v5306_v49 }
 0x111   :  { %v4161_v15 = vpop.eup %4160  ;;  %4180 = vrcp.f32 %v1898_v10  ;;  %v1828_v16 = vadd.f32 1.0, %v4159_v12  ;;  %2422 = vperm.xlu1 %4099, %v4143_v55   ;;  %v5330_v19 = vpop.f32.mrb[22].mxu0 }
 0x112   :  { %v4163_v17 = vpop.eup %4162  ;;  %4182 = vrcp.f32 %v1897_v13  ;;  %v1827_v18 = vadd.f32 1.0, %v4161_v15  ;;  %v5332_v20 = vpop.f32.mrb[22].mxu1 }
 0x113   :  { %v4165_v21 = vpop.eup %4164  ;;  %4184 = vrcp.f32 %v1828_v16  ;;  %v1900_v22 = vadd.f32 1.0, %v4163_v17  ;;  %v5334_v23 = vpop.f32.mrb[23].mxu0  ;;  %v3640_v16 = vmul.f32 -1.442695, %v5312_v54  ;;  %v3643_v54 = vmul.f32 -1.442695, %v5316_v62 }
 0x114   :  { %v4167_v25 = vpop.eup %4166  ;;  %4186 = vrcp.f32 %v1827_v18  ;;  %v1899_v26 = vadd.f32 1.0, %v4165_v21  ;;  %v5336_v27 = vpop.f32.mrb[23].mxu1  ;;  %2777 = vperm.xlu0 %4098, %v4149_v63   ;;  %v3566_v63 = vmul.f32 -1.442695, %v5302_v41  ;;  %v3571_v21 = vmul.f32 -1.442695, %v5314_v61 }
 0x115   :  { %v4169_v28 = vpop.eup %4168  ;;  %4188 = vrcp.f32 %v1900_v22  ;;  %v1830_v29 = vadd.f32 1.0, %v4167_v25  ;;  %2782 = vperm.xlu1 %4099, %v4147_v59   ;;  %v5338_v33 = vpop.f32.mrb[24].mxu0 }
 0x116   :  { %v4171_v30 = vpop.eup %4170  ;;  %4190 = vrcp.f32 %v1899_v26  ;;  %v1829_v31 = vadd.f32 1.0, %v4169_v28  ;;  %v5340_v34 = vpop.f32.mrb[24].mxu1 }
 0x117   :  { %v4173_v35 = vpop.eup %4172  ;;  %4192 = vrcp.f32 %v1830_v29  ;;  %v1902_v36 = vadd.f32 1.0, %v4171_v30  ;;  %v5342_v39 = vpop.f32.mrb[25].mxu0 }
 0x118   :  { %v4175_v40 = vpop.eup %4174  ;;  %4194 = vrcp.f32 %v1829_v31  ;;  %v1901_v43 = vadd.f32 1.0, %v4173_v35  ;;  %v5344_v44 = vpop.f32.mrb[25].mxu1 }
 0x119   :  { %v4177_v45 = vpop.eup %4176  ;;  %4196 = vrcp.f32 %v1902_v36  ;;  %v1832_v46 = vadd.f32 1.0, %v4175_v40  ;;  %2432 = vperm.xlu1 %4099, %v4151_v3   ;;  %v5348_v55 = vpop.f32.mrb[26].mxu0 }
 0x11a   :  { %v4179_v48 = vpop.eup %4178  ;;  %4198 = vrcp.f32 %v1901_v43  ;;  %v1831_v51 = vadd.f32 1.0, %v4177_v45  ;;  %v5350_v56 = vpop.f32.mrb[26].mxu1 }
 0x11b   :  { %v4181_v57 = vpop.eup %4180  ;;  %4200 = vrcp.f32 %v1832_v46  ;;  %2427 = vperm.xlu0 %4098, %v4179_v48   ;;  %v5353_v59 = vpop.f32.mrb[27].mxu0 }
 0x11c   :  { %v5355_v60 = vpop.f32.mrb[27].mxu1  ;;  %v4183_v24 = vpop.eup %4182  ;;  %4202 = vrcp.f32 %v1831_v51 }
 0x11d   :  { %v4185_v0 = vpop.eup %4184  ;;  %4204 = vpow2.f32 %v3637_v47  ;;  %2792 = vperm.xlu1 %4099, %v4181_v57   ;;  %v5360_v5 = vpop.f32.mrb[28].mxu0 }
 0x11e   :  { %v4187_v3 = vpop.eup %4186  ;;  %4206 = vpow2.f32 %v3636_v52  ;;  %v5362_v37 = vpop.f32.mrb[28].mxu1 }
 0x11f   :  { %v4189_v6 = vpop.eup %4188  ;;  %4208 = vpow2.f32 %v3567_v58  ;;  %2787 = vperm.xlu0 %4098, %v4183_v24   ;;  %v5365_v10 = vpop.f32.mrb[29].mxu0 }
 0x120   :  { %v5367_v41 = vpop.f32.mrb[29].mxu1  ;;  %v4191_v12 = vpop.eup %4190  ;;  %4210 = vpow2.f32 %v3566_v63 }
 0x121   :  { %v4193_v13 = vpop.eup %4192  ;;  %4212 = vpow2.f32 %v3639_v32  ;;  %2442 = vperm.xlu1 %4099, %v4185_v0   ;;  %v5372_v17 = vpop.f32.mrb[30].mxu0 }
 0x122   :  { %v4195_v15 = vpop.eup %4194  ;;  %4214 = vpow2.f32 %v3638_v4  ;;  %v5374_v49 = vpop.f32.mrb[30].mxu1 }
 0x123   :  { %v4197_v18 = vpop.eup %4196  ;;  %2437 = vperm.xlu0 %4098, %v4187_v3   ;;  %4216 = vpow2.f32 %v3569_v9  ;;  %v5377_v22 = vpop.f32.mrb[31].mxu0 }
 0x124   :  { %v5379_v53 = vpop.f32.mrb[31].mxu1  ;;  %v4199_v25 = vpop.eup %4198  ;;  %4218 = vpow2.f32 %v3568_v38 }
 0x125   :  { %v4201_v26 = vpop.eup %4200  ;;  %4220 = vpow2.f32 %v3641_v42  ;;  %2802 = vperm.xlu1 %4099, %v4189_v6   ;;  %v5383_v29 = vpop.f32.mrb[32].mxu0 }
 0x126   :  { %v4203_v28 = vpop.eup %4202  ;;  %4222 = vpow2.f32 %v3640_v16  ;;  %v5385_v30 = vpop.f32.mrb[32].mxu1 }
 0x127   :  { %v4205_v61 = vpop.eup %4204  ;;  %2797 = vperm.xlu0 %4098, %v4191_v12   ;;  %4224 = vpow2.f32 %v3571_v21  ;;  %v5387_v31 = vpop.f32.mrb[33].mxu0 }
 0x128   :  { %v5389_v35 = vpop.f32.mrb[33].mxu1  ;;  %v4207_v36 = vpop.eup %4206  ;;  %v1904_v1 = vadd.f32 1.0, %v4205_v61  ;;  %4226 = vpow2.f32 %v3570_v50 }
 0x129   :  { %v4209_v40 = vpop.eup %4208  ;;  %v1903_v43 = vadd.f32 1.0, %v4207_v36  ;;  %4228 = vpow2.f32 %v3643_v54  ;;  %2452 = vperm.xlu1 %4099, %v4193_v13   ;;  %v5391_v46 = vpop.f32.mrb[34].mxu0 }
 0x12a   :  { %v4211_v62 = vpop.eup %4210  ;;  %4230 = vrcp.f32 %v1904_v1  ;;  %v1834_v45 = vadd.f32 1.0, %v4209_v40  ;;  %v5393_v47 = vpop.f32.mrb[34].mxu1  ;;  %v3642_v1 = vmul.f32 -1.442695, %v5320_v2 }
 0x12b   :  { %v4213_v48 = vpop.eup %4212  ;;  %4232 = vrcp.f32 %v1903_v43  ;;  %v1833_v51 = vadd.f32 1.0, %v4211_v62  ;;  %2447 = vperm.xlu0 %4098, %v4195_v15   ;;  %v5395_v52 = vpop.f32.mrb[35].mxu0 }
 0x12c   :  { %v4215_v57 = vpop.eup %4214  ;;  %4234 = vrcp.f32 %v1834_v45  ;;  %v1906_v58 = vadd.f32 1.0, %v4213_v48  ;;  %v5397_v24 = vpop.f32.mrb[35].mxu1  ;;  %v3573_v45 = vmul.f32 -1.442695, %v5322_v7  ;;  %v3644_v7 = vmul.f32 -1.442695, %v5328_v14 }
 0x12d   :  { %v4217_v63 = vpop.eup %4216  ;;  %4236 = vrcp.f32 %v1833_v51  ;;  %v1905_v0 = vadd.f32 1.0, %v4215_v57  ;;  %2812 = vperm.xlu1 %4099, %v4197_v18   ;;  %v5399_v4 = vpop.f32.mrb[36].mxu0  ;;  %v3572_v51 = vmul.f32 -1.442695, %v5326_v11  ;;  %v3575_v11 = vmul.f32 -1.442695, %v5330_v19 }
 0x12e   :  { %v4219_v32 = vpop.eup %4218  ;;  %4238 = vrcp.f32 %v1906_v58  ;;  %v1836_v3 = vadd.f32 1.0, %v4217_v63  ;;  %v5401_v6 = vpop.f32.mrb[36].mxu1  ;;  %v3645_v58 = vmul.f32 -1.442695, %v5324_v8  ;;  %v3574_v8 = vmul.f32 -1.442695, %v5334_v23 }
 0x12f   :  { %v4221_v9 = vpop.eup %4220  ;;  %4240 = vrcp.f32 %v1905_v0  ;;  %v1835_v12 = vadd.f32 1.0, %v4219_v32  ;;  %2807 = vperm.xlu0 %4098, %v4199_v25   ;;  %v5403_v38 = vpop.f32.mrb[37].mxu0  ;;  %v3577_v23 = vmul.f32 -1.442695, %v5338_v33 }
 0x130   :  { %v4223_v13 = vpop.eup %4222  ;;  %4242 = vrcp.f32 %v1836_v3  ;;  %v1908_v42 = vadd.f32 1.0, %v4221_v9  ;;  %v5405_v15 = vpop.f32.mrb[37].mxu1 }
 0x131   :  { %v4225_v16 = vpop.eup %4224  ;;  %4244 = vrcp.f32 %v1835_v12  ;;  %v1907_v21 = vadd.f32 1.0, %v4223_v13  ;;  %2462 = vperm.xlu1 %4099, %v4201_v26   ;;  %v5407_v54 = vpop.f32.mrb[38].mxu0  ;;  %v3647_v13 = vmul.f32 -1.442695, %v5332_v20  ;;  %v3576_v20 = vmul.f32 -1.442695, %v5342_v39 }
 0x132   :  { %v4227_v50 = vpop.eup %4226  ;;  %4246 = vrcp.f32 %v1908_v42  ;;  %v1838_v18 = vadd.f32 1.0, %v4225_v16  ;;  %v5409_v61 = vpop.f32.mrb[38].mxu1 }
 0x133   :  { %v4229_v36 = vpop.eup %4228  ;;  %4248 = vrcp.f32 %v1907_v21  ;;  %v1837_v25 = vadd.f32 1.0, %v4227_v50  ;;  %2457 = vperm.xlu0 %4098, %v4203_v28   ;;  %v5412_v40 = vpop.f32.mrb[39].mxu0  ;;  %v3646_v21 = vmul.f32 -1.442695, %v5336_v27 }
 0x134   :  { %v4231_v43 = vpop.eup %4230  ;;  %4250 = vrcp.f32 %v1838_v18  ;;  %v1910_v62 = vadd.f32 1.0, %v4229_v36  ;;  %v5415_v48 = vpop.f32.mrb[39].mxu1 }
 0x135   :  { %v4233_v26 = vpop.eup %4232  ;;  %4252 = vrcp.f32 %v1837_v25  ;;  %2822 = vperm.xlu1 %4099, %v4231_v43   ;;  %v5419_v2 = vpop.f32.mrb[40].mxu0 }
 0x136   :  { %v4235_v57 = vpop.eup %4234  ;;  %4254 = vrcp.f32 %v1910_v62  ;;  %v5421_v28 = vpop.f32.mrb[40].mxu1 }
 0x137   :  { %v4237_v63 = vpop.eup %4236  ;;  %4256 = vpow2.f32 %v3642_v1  ;;  %2817 = vperm.xlu0 %4098, %v4233_v26   ;;  %v5424_v0 = vpop.f32.mrb[41].mxu0  ;;  %v3649_v1 = vmul.f32 -1.442695, %v5340_v34 }
 0x138   :  { %v5426_v32 = vpop.f32.mrb[41].mxu1  ;;  %v4239_v3 = vpop.eup %4238  ;;  %4258 = vpow2.f32 %v3573_v45  ;;  %v3648_v45 = vmul.f32 -1.442695, %v5344_v44 }
 0x139   :  { %v4241_v9 = vpop.eup %4240  ;;  %4260 = vpow2.f32 %v3572_v51  ;;  %2472 = vperm.xlu1 %4099, %v4235_v57   ;;  %v5431_v42 = vpop.f32.mrb[42].mxu0 }
 0x13a   :  { %v4243_v12 = vpop.eup %4242  ;;  %4262 = vpow2.f32 %v3645_v58  ;;  %v5433_v14 = vpop.f32.mrb[42].mxu1 }
 0x13b   :  { %v4245_v16 = vpop.eup %4244  ;;  %4264 = vpow2.f32 %v3644_v7  ;;  %2467 = vperm.xlu0 %4098, %v4237_v63   ;;  %v5436_v50 = vpop.f32.mrb[43].mxu0 }
 0x13c   :  { %v5438_v19 = vpop.f32.mrb[43].mxu1  ;;  %v4247_v18 = vpop.eup %4246  ;;  %4266 = vpow2.f32 %v3575_v11 }
 0x13d   :  { %v4249_v36 = vpop.eup %4248  ;;  %4268 = vpow2.f32 %v3574_v8  ;;  %2832 = vperm.xlu1 %4099, %v4239_v3   ;;  %v5443_v43 = vpop.f32.mrb[44].mxu0 }
 0x13e   :  { %v4251_v25 = vpop.eup %4250  ;;  %4270 = vpow2.f32 %v3647_v13  ;;  %v5445_v27 = vpop.f32.mrb[44].mxu1 }
 0x13f   :  { %v4253_v62 = vpop.eup %4252  ;;  %2827 = vperm.xlu0 %4098, %v4241_v9   ;;  %4272 = vpow2.f32 %v3646_v21  ;;  %v5448_v26 = vpop.f32.mrb[45].mxu0 }
 0x140   :  { %v5450_v33 = vpop.f32.mrb[45].mxu1  ;;  %v4255_v51 = vpop.eup %4254  ;;  %4274 = vpow2.f32 %v3577_v23 }
 0x141   :  { %v4257_v39 = vpop.eup %4256  ;;  %4276 = vpow2.f32 %v3576_v20  ;;  %2482 = vperm.xlu1 %4099, %v4243_v12   ;;  %v5452_v34 = vpop.f32.mrb[46].mxu0 }
 0x142   :  { %v4259_v57 = vpop.eup %4258  ;;  %v1909_v58 = vadd.f32 1.0, %v4257_v39  ;;  %4278 = vpow2.f32 %v3649_v1  ;;  %v5454_v63 = vpop.f32.mrb[46].mxu1 }
 0x143   :  { %v4261_v7 = vpop.eup %4260  ;;  %v1840_v3 = vadd.f32 1.0, %v4259_v57  ;;  %2477 = vperm.xlu0 %4098, %v4245_v16   ;;  %4280 = vpow2.f32 %v3648_v45  ;;  %v5456_v44 = vpop.f32.mrb[47].mxu0 }
 0x144   :  { %v4263_v11 = vpop.eup %4262  ;;  %4282 = vrcp.f32 %v1909_v58  ;;  %v1839_v9 = vadd.f32 1.0, %v4261_v7  ;;  %v5458_v8 = vpop.f32.mrb[47].mxu1 }
 0x145   :  { %v4265_v13 = vpop.eup %4264  ;;  %4284 = vrcp.f32 %v1840_v3  ;;  %v1912_v21 = vadd.f32 1.0, %v4263_v11  ;;  %2842 = vperm.xlu1 %4099, %v4247_v18   ;;  %v5460_v20 = vpop.f32.mrb[48].mxu0 }
 0x146   :  { %v4267_v12 = vpop.eup %4266  ;;  %4286 = vrcp.f32 %v1839_v9  ;;  %v1911_v23 = vadd.f32 1.0, %v4265_v13  ;;  %v5462_v1 = vpop.f32.mrb[48].mxu1 }
 0x147   :  { %6693 = vst [vmem:[#allocation2_spill] sm:$0xff] %v5462_v1  ;;  %v4269_v16 = vpop.eup %4268  ;;  %4288 = vrcp.f32 %v1912_v21  ;;  %v1842_v45 = vadd.f32 1.0, %v4267_v12  ;;  %2837 = vperm.xlu0 %4098, %v4249_v36   ;;  %v5464_v39 = vpop.f32.mrb[49].mxu0 }
 0x148   :  { %v4271_v57 = vpop.eup %4270  ;;  %4290 = vrcp.f32 %v1911_v23  ;;  %v1841_v58 = vadd.f32 1.0, %v4269_v16  ;;  %v5466_v7 = vpop.f32.mrb[49].mxu1 }
 0x149   :  { %6694 = vst [vmem:[#allocation3_spill] sm:$0xff] %v5466_v7  ;;  %v4273_v3 = vpop.eup %4272  ;;  %4292 = vrcp.f32 %v1842_v45  ;;  %v1914_v11 = vadd.f32 1.0, %v4271_v57  ;;  %2492 = vperm.xlu1 %4099, %v4251_v25   ;;  %v5468_v13 = vpop.f32.mrb[50].mxu0  ;;  %v3579_v25 = vmul.f32 -1.442695, %v5348_v55 }
 0x14a   :  { %v4275_v9 = vpop.eup %4274  ;;  %4294 = vrcp.f32 %v1841_v58  ;;  %v1913_v18 = vadd.f32 1.0, %v4273_v3  ;;  %v5470_v1 = vpop.f32.mrb[50].mxu1 }
 0x14b   :  { %6695 = vst [vmem:[#allocation4_spill] sm:$0xff] %v5470_v1  ;;  %v4277_v21 = vpop.eup %4276  ;;  %4296 = vrcp.f32 %v1914_v11  ;;  %v1844_v36 = vadd.f32 1.0, %v4275_v9  ;;  %2487 = vperm.xlu0 %4098, %v4253_v62   ;;  %v5472_v12 = vpop.f32.mrb[51].mxu0  ;;  %v3578_v11 = vmul.f32 -1.442695, %v5353_v59 }
 0x14c   :  { %v4279_v23 = vpop.eup %4278  ;;  %4298 = vrcp.f32 %v1913_v18  ;;  %v1843_v16 = vadd.f32 1.0, %v4277_v21  ;;  %v5474_v7 = vpop.f32.mrb[51].mxu1  ;;  %v3651_v18 = vmul.f32 -1.442695, %v5350_v56  ;;  %v3581_v59 = vmul.f32 -1.442695, %v5360_v5 }
 0x14d   :  { %v4281_v45 = vpop.eup %4280  ;;  %4300 = vrcp.f32 %v1844_v36  ;;  %v1916_v57 = vadd.f32 1.0, %v4279_v23  ;;  %2852 = vperm.xlu1 %4099, %v4255_v51   ;;  %v5478_v9 = vpop.f32.mrb[52].mxu0  ;;  %v3650_v23 = vmul.f32 -1.442695, %v5355_v60  ;;  %v3652_v5 = vmul.f32 -1.442695, %v5367_v41 }
 0x14e   :  { %v4283_v58 = vpop.eup %4282  ;;  %4302 = vrcp.f32 %v1843_v16  ;;  %v1915_v3 = vadd.f32 1.0, %v4281_v45  ;;  %v5480_v62 = vpop.f32.mrb[52].mxu1  ;;  %v3580_v45 = vmul.f32 -1.442695, %v5365_v10  ;;  %v3583_v10 = vmul.f32 -1.442695, %v5372_v17 }
 0x14f   :  { %v4285_v1 = vpop.eup %4284  ;;  %4304 = vrcp.f32 %v1916_v57  ;;  %2847 = vperm.xlu0 %4098, %v4283_v58   ;;  %v5483_v21 = vpop.f32.mrb[53].mxu0  ;;  %v3654_v17 = vmul.f32 -1.442695, %v5379_v53 }
 0x150   :  { %v5485_v36 = vpop.f32.mrb[53].mxu1  ;;  %v4287_v55 = vpop.eup %4286  ;;  %4306 = vrcp.f32 %v1915_v3  ;;  %v3653_v3 = vmul.f32 -1.442695, %v5362_v37 }
 0x151   :  { %6696 = vst [vmem:[#allocation5_spill] sm:$0xff] %v5485_v36  ;;  %v4289_v51 = vpop.eup %4288  ;;  %4308 = vpow2.f32 %v3579_v25  ;;  %2502 = vperm.xlu1 %4099, %v4285_v1   ;;  %v5490_v57 = vpop.f32.mrb[54].mxu0 }
 0x152   :  { %v4291_v16 = vpop.eup %4290  ;;  %4310 = vpow2.f32 %v3578_v11  ;;  %v5492_v56 = vpop.f32.mrb[54].mxu1 }
 0x153   :  { %6697 = vst [vmem:[#allocation6_spill] sm:$0xff] %v5492_v56  ;;  %v4293_v58 = vpop.eup %4292  ;;  %4312 = vpow2.f32 %v3651_v18  ;;  %2497 = vperm.xlu0 %4098, %v4287_v55   ;;  %v5495_v36 = vpop.f32.mrb[55].mxu0  ;;  %v3582_v18 = vmul.f32 -1.442695, %v5377_v22  ;;  %v3585_v22 = vmul.f32 -1.442695, %v5383_v29 }
 0x154   :  { %v5497_v60 = vpop.f32.mrb[55].mxu1  ;;  %v4295_v25 = vpop.eup %4294  ;;  %4314 = vpow2.f32 %v3650_v23  ;;  %v3655_v23 = vmul.f32 -1.442695, %v5374_v49 }
 0x155   :  { %6698 = vst [vmem:[#allocation7_spill] sm:$0xff] %v5497_v60  ;;  %v4297_v1 = vpop.eup %4296  ;;  %4316 = vpow2.f32 %v3581_v59  ;;  %2862 = vperm.xlu1 %4099, %v4289_v51   ;;  %v5502_v55 = vpop.f32.mrb[56].mxu0 }
 0x156   :  { %v4299_v11 = vpop.eup %4298  ;;  %4318 = vpow2.f32 %v3580_v45  ;;  %v5504_v37 = vpop.f32.mrb[56].mxu1 }
 0x157   :  { %6699 = vst [vmem:[#allocation8_spill] sm:$0xff] %v5504_v37  ;;  %v4301_v56 = vpop.eup %4300  ;;  %2857 = vperm.xlu0 %4098, %v4291_v16   ;;  %4320 = vpow2.f32 %v3653_v3  ;;  %v5507_v60 = vpop.f32.mrb[57].mxu0 }
 0x158   :  { %6700 = vst [vmem:[#allocation9_spill] sm:$0xff] %v5507_v60  ;;  %v5509_v41 = vpop.f32.mrb[57].mxu1  ;;  %v4303_v59 = vpop.eup %4302  ;;  %4322 = vpow2.f32 %v3652_v5 }
 0x159   :  { %6701 = vst [vmem:[#allocation10_spill] sm:$0xff] %v5509_v41  ;;  %v4305_v51 = vpop.eup %4304  ;;  %4324 = vpow2.f32 %v3583_v10  ;;  %2512 = vperm.xlu1 %4099, %v4293_v58   ;;  %v5513_v37 = vpop.f32.mrb[58].mxu0 }
 0x15a   :  { %v4307_v45 = vpop.eup %4306  ;;  %4326 = vpow2.f32 %v3582_v18  ;;  %v5515_v16 = vpop.f32.mrb[58].mxu1 }
 0x15b   :  { %6702 = vst [vmem:[#allocation11_spill] sm:$0xff] %v5515_v16  ;;  %v4309_v49 = vpop.eup %4308  ;;  %2507 = vperm.xlu0 %4098, %v4295_v25   ;;  %4328 = vpow2.f32 %v3655_v23  ;;  %v5517_v3 = vpop.f32.mrb[59].mxu0 }
 0x15c   :  { %6703 = vst [vmem:[#allocation12_spill] sm:$0xff] %v5517_v3  ;;  %v5519_v41 = vpop.f32.mrb[59].mxu1  ;;  %v4311_v5 = vpop.eup %4310  ;;  %v1846_v53 = vadd.f32 1.0, %v4309_v49  ;;  %4330 = vpow2.f32 %v3654_v17 }
 0x15d   :  { %6704 = vst [vmem:[#allocation13_spill] sm:$0xff] %v5519_v41  ;;  %v4313_v10 = vpop.eup %4312  ;;  %v1845_v60 = vadd.f32 1.0, %v4311_v5  ;;  %4332 = vpow2.f32 %v3585_v22  ;;  %2872 = vperm.xlu1 %4099, %v4297_v1   ;;  %v5521_v18 = vpop.f32.mrb[60].mxu0 }
 0x15e   :  { %v4315_v29 = vpop.eup %4314  ;;  %4334 = vrcp.f32 %v1846_v53  ;;  %v1918_v58 = vadd.f32 1.0, %v4313_v10  ;;  %v5523_v16 = vpop.f32.mrb[60].mxu1 }
 0x15f   :  { %6705 = vst [vmem:[#allocation14_spill] sm:$0xff] %v5523_v16  ;;  %v4317_v25 = vpop.eup %4316  ;;  %4336 = vrcp.f32 %v1845_v60  ;;  %v1917_v23 = vadd.f32 1.0, %v4315_v29  ;;  %2867 = vperm.xlu0 %4098, %v4299_v11   ;;  %v5525_v3 = vpop.f32.mrb[61].mxu0 }
 0x160   :  { %v4319_v41 = vpop.eup %4318  ;;  %4338 = vrcp.f32 %v1918_v58  ;;  %v1848_v17 = vadd.f32 1.0, %v4317_v25  ;;  %v5527_v49 = vpop.f32.mrb[61].mxu1 }
 0x161   :  { %6706 = vst [vmem:[#allocation15_spill] sm:$0xff] %v5527_v49  ;;  %v4321_v22 = vpop.eup %4320  ;;  %4340 = vrcp.f32 %v1917_v23  ;;  %v1847_v5 = vadd.f32 1.0, %v4319_v41  ;;  %2522 = vperm.xlu1 %4099, %v4301_v56   ;;  %v5529_v10 = vpop.f32.mrb[62].mxu0 }
 0x162   :  { %v4323_v53 = vpop.eup %4322  ;;  %4342 = vrcp.f32 %v1848_v17  ;;  %v1920_v1 = vadd.f32 1.0, %v4321_v22  ;;  %v5531_v11 = vpop.f32.mrb[63].mxu0 }
 0x163   :  { %v4325_v16 = vpop.eup %4324  ;;  %4344 = vrcp.f32 %v1847_v5  ;;  %v1919_v60 = vadd.f32 1.0, %v4323_v53  ;;  %2517 = vperm.xlu0 %4098, %v4303_v59   ;;  %v5533_v29 = vpop.f32.mrb[62].mxu1  ;;  %v3584_v59 = vmul.f32 -1.442695, %v5387_v31  ;;  %v3586_v31 = vmul.f32 -1.442695, %v5395_v52 }
 0x164   :  { %6707 = vst [vmem:[#allocation16_spill] sm:$0xff] %v5533_v29  ;;  %v4327_v58 = vpop.eup %4326  ;;  %4346 = vrcp.f32 %v1920_v1  ;;  %v1850_v25 = vadd.f32 1.0, %v4325_v16  ;;  %v5535_v49 = vpop.f32.mrb[63].mxu1  ;;  %v3657_v1 = vmul.f32 -1.442695, %v5385_v30 }
 0x165   :  { %6708 = vst [vmem:[#allocation17_spill] sm:$0xff] %v5535_v49  ;;  %v4329_v41 = vpop.eup %4328  ;;  %4348 = vrcp.f32 %v1919_v60  ;;  %v1849_v23 = vadd.f32 1.0, %v4327_v58  ;;  %2882 = vperm.xlu1 %4099, %v4305_v51   ;;  %v5538_v53 = vpop.f32.mrb[64].mxu0  ;;  %v3656_v58 = vmul.f32 -1.442695, %v5389_v35 }
 0x166   :  { %v4331_v17 = vpop.eup %4330  ;;  %4350 = vrcp.f32 %v1850_v25  ;;  %v1922_v56 = vadd.f32 1.0, %v4329_v41  ;;  %v5541_v49 = vpop.f32.mrb[65].mxu0  ;;  %v3659_v30 = vmul.f32 -1.442695, %v5393_v47  ;;  %v3658_v35 = vmul.f32 -1.442695, %v5397_v24 }
 0x167   :  { %v4333_v22 = vpop.eup %4332  ;;  %4352 = vrcp.f32 %v1849_v23  ;;  %v1921_v5 = vadd.f32 1.0, %v4331_v17  ;;  %2877 = vperm.xlu0 %4098, %v4307_v45   ;;  %v3587_v45 = vmul.f32 -1.442695, %v5391_v46  ;;  %v5546_v41 = vpop.f32.mrb[64].mxu1  ;;  %v3589_v46 = vmul.f32 -1.442695, %v5399_v4 }
 0x168   :  { %v4335_v29 = vpop.eup %4334  ;;  %4354 = vrcp.f32 %v1922_v56  ;;  %v1852_v16 = vadd.f32 1.0, %v4333_v22  ;;  %v5549_v17 = vpop.f32.mrb[65].mxu1  ;;  %v3588_v52 = vmul.f32 -1.442695, %v5403_v38  ;;  %v3661_v47 = vmul.f32 -1.442695, %v5401_v6 }
 0x169   :  { %v4337_v60 = vpop.eup %4336  ;;  %4356 = vrcp.f32 %v1921_v5  ;;  %2532 = vperm.xlu1 %4099, %v4335_v29   ;;  %v5554_v5 = vpop.f32.mrb[66].mxu0  ;;  %v3660_v24 = vmul.f32 -1.442695, %v5405_v15  ;;  %v3591_v4 = vmul.f32 -1.442695, %v5407_v54 }
 0x16a   :  { %v4339_v51 = vpop.eup %4338  ;;  %4358 = vrcp.f32 %v1852_v16  ;;  %v5557_v16 = vpop.f32.mrb[67].mxu0  ;;  %v3590_v38 = vmul.f32 -1.442695, %v5412_v40 }
 0x16b   :  { %v4341_v25 = vpop.eup %4340  ;;  %4360 = vpow2.f32 %v3584_v59  ;;  %2527 = vperm.xlu0 %4098, %v4337_v60  }
 0x16c   :  { %v4343_v23 = vpop.eup %4342  ;;  %4362 = vpow2.f32 %v3657_v1 }
 0x16d   :  { %v4345_v56 = vpop.eup %4344  ;;  %4364 = vpow2.f32 %v3656_v58  ;;  %2892 = vperm.xlu1 %4099, %v4339_v51   ;;  %v5562_v51 = vpop.f32.mrb[66].mxu1 }
 0x16e   :  { %v4347_v29 = vpop.eup %4346  ;;  %4366 = vpow2.f32 %v3587_v45  ;;  %v5566_v6 = vpop.f32.mrb[67].mxu1 }
 0x16f   :  { %v4349_v22 = vpop.eup %4348  ;;  %2887 = vperm.xlu0 %4098, %v4341_v25   ;;  %4368 = vpow2.f32 %v3586_v31 }
 0x170   :  { %v4351_v59 = vpop.eup %4350  ;;  %4370 = vpow2.f32 %v3659_v30  ;;  %v5568_v30 = vpop.f32.mrb[68].mxu0 }
 0x171   :  { %v4353_v1 = vpop.eup %4352  ;;  %4372 = vpow2.f32 %v3658_v35  ;;  %2542 = vperm.xlu1 %4099, %v4343_v23   ;;  %v5570_v35 = vpop.f32.mrb[69].mxu0 }
 0x172   :  { %v4355_v60 = vpop.eup %4354  ;;  %4374 = vpow2.f32 %v3589_v46 }
 0x173   :  { %v4357_v58 = vpop.eup %4356  ;;  %2537 = vperm.xlu0 %4098, %v4345_v56   ;;  %4376 = vpow2.f32 %v3588_v52 }
 0x174   :  { %v5564_v45 = vpop.eup %4358  ;;  %4378 = vpow2.f32 %v3661_v47 }
 0x175   :  { %v4361_v25 = vpop.eup %4360  ;;  %4380 = vpow2.f32 %v3660_v24  ;;  %2902 = vperm.xlu1 %4099, %v4347_v29  }
 0x176   :  { %v4363_v15 = vpop.eup %4362  ;;  %v1851_v31 = vadd.f32 1.0, %v4361_v25  ;;  %4382 = vpow2.f32 %v3591_v4 }
 0x177   :  { %v4365_v23 = vpop.eup %4364  ;;  %v1924_v54 = vadd.f32 1.0, %v4363_v15  ;;  %2897 = vperm.xlu0 %4098, %v4349_v22   ;;  %4384 = vpow2.f32 %v3590_v38  ;;  %v5572_v22 = vpop.f32.mrb[68].mxu1 }
 0x178   :  { %v4367_v40 = vpop.eup %4366  ;;  %4386 = vrcp.f32 %v1851_v31  ;;  %v1923_v56 = vadd.f32 1.0, %v4365_v23  ;;  %6709 = vst [vmem:[#allocation18_spill] sm:$0xff] %v5572_v22  ;;  %v5574_v15 = vpop.f32.mrb[69].mxu1  ;;  %v3662_v22 = vmul.f32 -1.442695, %v5415_v48 }
 0x179   :  { %v4369_v46 = vpop.eup %4368  ;;  %4388 = vrcp.f32 %v1924_v54  ;;  %v1854_v52 = vadd.f32 1.0, %v4367_v40  ;;  %2552 = vperm.xlu1 %4099, %v4351_v59   ;;  %6710 = vst [vmem:[#allocation19_spill] sm:$0xff] %v5574_v15  ;;  %v2252_v59 = vld [vmem:[%s6691_s2 + $0x8] sm:$0xff]  ;;  %v3593_v48 = vmul.f32 -1.442695, %v5419_v2 }
 0x17a   :  { %v4371_v47 = vpop.eup %4370  ;;  %4390 = vrcp.f32 %v1923_v56  ;;  %v1853_v24 = vadd.f32 1.0, %v4369_v46  ;;  %v2324_v46 = vld [vmem:[%s6691_s2 + $0x248] sm:$0xff]  ;;  %v3665_v2 = vmul.f32 -1.442695, %v5421_v28  ;;  %v2326_v28 = vld [vmem:[%s6691_s2 + $0x258] sm:$0xff] }
 0x17b   :  { %v4373_v29 = vpop.eup %4372  ;;  %4392 = vrcp.f32 %v1854_v52  ;;  %v1926_v4 = vadd.f32 1.0, %v4371_v47  ;;  %2547 = vperm.xlu0 %4098, %v4353_v1   ;;  %v5582_v52 = vpop.f32.mrb[70].mxu0 }
 0x17c   :  { %v4375_v38 = vpop.eup %4374  ;;  %4394 = vrcp.f32 %v1853_v24  ;;  %v1925_v25 = vadd.f32 1.0, %v4373_v29 }
 0x17d   :  { %v4377_v31 = vpop.eup %4376  ;;  %4396 = vrcp.f32 %v1926_v4  ;;  %v1856_v23 = vadd.f32 1.0, %v4375_v38  ;;  %2912 = vperm.xlu1 %4099, %v4355_v60   ;;  %v5584_v4 = vpop.f32.mrb[71].mxu0 }
 0x17e   :  { %v4379_v54 = vpop.eup %4378  ;;  %4398 = vrcp.f32 %v1925_v25  ;;  %v1855_v40 = vadd.f32 1.0, %v4377_v31  ;;  %v3663_v31 = vmul.f32 -1.442695, %v5409_v61  ;;  %v2254_v61 = vld [vmem:[%s6691_s2 + $0x18] sm:$0xff] }
 0x17f   :  { %v4381_v56 = vpop.eup %4380  ;;  %4400 = vrcp.f32 %v1856_v23  ;;  %v1928_v1 = vadd.f32 1.0, %v4379_v54  ;;  %2907 = vperm.xlu0 %4098, %v4357_v58   ;;  %v2403_v29 = vpop.permute.xlu0 %2402 }
 0x180   :  { %v4383_v47 = vpop.eup %4382  ;;  %4402 = vrcp.f32 %v1855_v40  ;;  %v1927_v24 = vadd.f32 1.0, %v4381_v56  ;;  %v2763_v25 = vpop.permute.xlu1 %2762  ;;  %v3116_v23 = vmul.f32 %v2403_v29, %v2252_v59  ;;  %v2251_v40 = vld [vmem:[%s6691_s2] sm:$0xff] }
 0x181   :  { %v4385_v60 = vpop.eup %4384  ;;  %4404 = vrcp.f32 %v1928_v1  ;;  %v1858_v38 = vadd.f32 1.0, %v4383_v47  ;;  %v3188_v15 = vmul.f32 %v2763_v25, %v2324_v46  ;;  %2562 = vperm.xlu1 %4099, %v5564_v45   ;;  %v5600_v59 = vpop.f32.mrb[70].mxu1  ;;  %v3592_v46 = vmul.f32 -1.442695, %v5424_v0 }
 0x182   :  { %v4387_v58 = vpop.eup %4386  ;;  %4406 = vrcp.f32 %v1927_v24  ;;  %v1857_v54 = vadd.f32 1.0, %v4385_v60  ;;  %3260 = vst.msk [vmem:[%s6692_s3 + $0x8] sm:$0xff] %vm165_vm0, %v3116_v23  ;;  %v5607_v47 = vpop.f32.mrb[71].mxu1  ;;  %v2323_v23 = vld [vmem:[%s6691_s2 + $0x240] sm:$0xff]  ;;  %v3595_v0 = vmul.f32 -1.442695, %v5431_v42 }
 0x183   :  { %v4389_v56 = vpop.eup %4388  ;;  %4408 = vrcp.f32 %v1858_v38  ;;  %2557 = vperm.xlu0 %4098, %v4387_v58   ;;  %3332 = vst.msk [vmem:[%s6692_s3 + $0x248] sm:$0xff] %vm165_vm0, %v3188_v15  ;;  %v2398_v1 = vpop.permute.xlu0 %2397  ;;  %v3664_v15 = vmul.f32 -1.442695, %v5426_v32  ;;  %v2325_v42 = vld [vmem:[%s6691_s2 + $0x250] sm:$0xff] }
 0x184   :  { %v4391_v45 = vpop.eup %4390  ;;  %4410 = vrcp.f32 %v1857_v54  ;;  %v3115_v29 = vmul.f32 %v2398_v1, %v2251_v40  ;;  %v2413_v60 = vpop.permute.xlu1 %2412  ;;  %v3666_v1 = vmul.f32 -1.442695, %v5438_v19 }
 0x185   :  { %v4393_v24 = vpop.eup %4392  ;;  %4412 = vpow2.f32 %v3663_v31  ;;  %v3118_v25 = vmul.f32 %v2413_v60, %v2254_v61  ;;  %2922 = vperm.xlu1 %4099, %v4389_v56   ;;  %v3594_v31 = vmul.f32 -1.442695, %v5436_v50  ;;  %v3667_v61 = vmul.f32 -1.442695, %v5433_v14  ;;  %v2253_v14 = vld [vmem:[%s6691_s2 + $0x10] sm:$0xff] }
 0x186   :  { %v4395_v38 = vpop.eup %4394  ;;  %4414 = vpow2.f32 %v3662_v22  ;;  %3259 = vst.msk [vmem:[%s6692_s3] sm:$0xff] %vm165_vm0, %v3115_v29  ;;  %v3597_v50 = vmul.f32 -1.442695, %v5443_v43  ;;  %v3596_v29 = vmul.f32 -1.442695, %v5448_v26 }
 0x187   :  { %v4397_v58 = vpop.eup %4396  ;;  %4416 = vpow2.f32 %v3593_v48  ;;  %2917 = vperm.xlu0 %4098, %v4391_v45   ;;  %3262 = vst.msk [vmem:[%s6692_s3 + $0x18] sm:$0xff] %vm165_vm0, %v3118_v25  ;;  %v2758_v32 = vpop.permute.xlu0 %2757  ;;  %v3669_v25 = vmul.f32 -1.442695, %v5445_v27  ;;  %v2256_v27 = vld [vmem:[%s6691_s2 + $0x28] sm:$0xff] }
 0x188   :  { %v4399_v22 = vpop.eup %4398  ;;  %4418 = vpow2.f32 %v3592_v46  ;;  %v3187_v40 = vmul.f32 %v2758_v32, %v2323_v23  ;;  %v2773_v56 = vpop.permute.xlu1 %2772 }
 0x189   :  { %v4401_v54 = vpop.eup %4400  ;;  %4420 = vpow2.f32 %v3665_v2  ;;  %v3190_v45 = vmul.f32 %v2773_v56, %v2326_v28  ;;  %2572 = vperm.xlu1 %4099, %v4393_v24  }
 0x18a   :  { %v4403_v48 = vpop.eup %4402  ;;  %4422 = vpow2.f32 %v3664_v15  ;;  %3331 = vst.msk [vmem:[%s6692_s3 + $0x240] sm:$0xff] %vm165_vm0, %v3187_v40  ;;  %v2255_v15 = vld [vmem:[%s6691_s2 + $0x20] sm:$0xff] }
 0x18b   :  { %v4405_v46 = vpop.eup %4404  ;;  %2567 = vperm.xlu0 %4098, %v4395_v38   ;;  %4424 = vpow2.f32 %v3595_v0  ;;  %3334 = vst.msk [vmem:[%s6692_s3 + $0x258] sm:$0xff] %vm165_vm0, %v3190_v45  ;;  %v2768_v19 = vpop.permute.xlu0 %2767 }
 0x18c   :  { %v4407_v24 = vpop.eup %4406  ;;  %4426 = vpow2.f32 %v3594_v31  ;;  %v3189_v2 = vmul.f32 %v2768_v19, %v2325_v42  ;;  %v2408_v38 = vpop.permute.xlu1 %2407  ;;  %v2327_v42 = vld [vmem:[%s6691_s2 + $0x260] sm:$0xff] }
 0x18d   :  { %v5645_v60 = vpop.eup %4408  ;;  %4428 = vpow2.f32 %v3667_v61  ;;  %v3117_v43 = vmul.f32 %v2408_v38, %v2253_v14  ;;  %2932 = vperm.xlu1 %4099, %v4397_v58  }
 0x18e   :  { %v5648_v23 = vpop.eup %4410  ;;  %4430 = vpow2.f32 %v3666_v1  ;;  %3333 = vst.msk [vmem:[%s6692_s3 + $0x250] sm:$0xff] %vm165_vm0, %v3189_v2 }
 0x18f   :  { %v4413_v28 = vpop.eup %4412  ;;  %2927 = vperm.xlu0 %4098, %v4399_v22   ;;  %4432 = vpow2.f32 %v3597_v50  ;;  %3261 = vst.msk [vmem:[%s6692_s3 + $0x10] sm:$0xff] %vm165_vm0, %v3117_v43  ;;  %v2418_v58 = vpop.permute.xlu0 %2417  ;;  %v2328_v50 = vld [vmem:[%s6691_s2 + $0x268] sm:$0xff] }
 0x190   :  { %v4415_v26 = vpop.eup %4414  ;;  %v1930_v0 = vadd.f32 1.0, %v4413_v28  ;;  %4434 = vpow2.f32 %v3596_v29  ;;  %v2423_v40 = vpop.permute.xlu1 %2422  ;;  %v3119_v56 = vmul.f32 %v2418_v58, %v2255_v15 }
 0x191   :  { %v4417_v32 = vpop.eup %4416  ;;  %v1929_v31 = vadd.f32 1.0, %v4415_v26  ;;  %4436 = vpow2.f32 %v3669_v25  ;;  %v3120_v45 = vmul.f32 %v2423_v40, %v2256_v27  ;;  %2582 = vperm.xlu1 %4099, %v4401_v54  }
 0x192   :  { %v4419_v22 = vpop.eup %4418  ;;  %4438 = vrcp.f32 %v1930_v0  ;;  %v1860_v61 = vadd.f32 1.0, %v4417_v32  ;;  %3263 = vst.msk [vmem:[%s6692_s3 + $0x20] sm:$0xff] %vm165_vm0, %v3119_v56  ;;  %v2258_v0 = vld [vmem:[%s6691_s2 + $0x38] sm:$0xff] }
 0x193   :  { %v4421_v1 = vpop.eup %4420  ;;  %4440 = vrcp.f32 %v1929_v31  ;;  %v1859_v14 = vadd.f32 1.0, %v4419_v22  ;;  %2577 = vperm.xlu0 %4098, %v4403_v48   ;;  %3264 = vst.msk [vmem:[%s6692_s3 + $0x28] sm:$0xff] %vm165_vm0, %v3120_v45  ;;  %v2778_v29 = vpop.permute.xlu0 %2777 }
 0x194   :  { %v4423_v19 = vpop.eup %4422  ;;  %4442 = vrcp.f32 %v1860_v61  ;;  %v1932_v54 = vadd.f32 1.0, %v4421_v1  ;;  %v2783_v25 = vpop.permute.xlu1 %2782  ;;  %v3191_v43 = vmul.f32 %v2778_v29, %v2327_v42 }
 0x195   :  { %v4425_v2 = vpop.eup %4424  ;;  %4444 = vrcp.f32 %v1859_v14  ;;  %v1931_v38 = vadd.f32 1.0, %v4423_v19  ;;  %v3192_v28 = vmul.f32 %v2783_v25, %v2328_v50  ;;  %2942 = vperm.xlu1 %4099, %v4405_v46   ;;  %v2257_v46 = vld [vmem:[%s6691_s2 + $0x30] sm:$0xff]  ;;  %v3668_v50 = vmul.f32 -1.442695, %v5450_v33  ;;  %v2330_v19 = vld [vmem:[%s6691_s2 + $0x278] sm:$0xff] }
 0x196   :  { %v4427_v15 = vpop.eup %4426  ;;  %4446 = vrcp.f32 %v1932_v54  ;;  %v1862_v48 = vadd.f32 1.0, %v4425_v2  ;;  %3335 = vst.msk [vmem:[%s6692_s3 + $0x260] sm:$0xff] %vm165_vm0, %v3191_v43  ;;  %v3599_v33 = vmul.f32 -1.442695, %v5452_v34 }
 0x197   :  { %v4429_v27 = vpop.eup %4428  ;;  %4448 = vrcp.f32 %v1931_v38  ;;  %v1861_v26 = vadd.f32 1.0, %v4427_v15  ;;  %2937 = vperm.xlu0 %4098, %v4407_v24   ;;  %3336 = vst.msk [vmem:[%s6692_s3 + $0x268] sm:$0xff] %vm165_vm0, %v3192_v28  ;;  %v3598_v38 = vmul.f32 -1.442695, %v5456_v44  ;;  %v3601_v44 = vmul.f32 -1.442695, %v5460_v20 }
 0x198   :  { %v4431_v58 = vpop.eup %4430  ;;  %4450 = vrcp.f32 %v1862_v48  ;;  %v1934_v32 = vadd.f32 1.0, %v4429_v27  ;;  %v2433_v24 = vpop.permute.xlu1 %2432  ;;  %v3671_v48 = vmul.f32 -1.442695, %v5454_v63  ;;  %v2260_v27 = vld [vmem:[%s6691_s2 + $0x48] sm:$0xff]  ;;  %v2259_v63 = vld [vmem:[%s6691_s2 + $0x40] sm:$0xff] }
 0x199   :  { %v4433_v31 = vpop.eup %4432  ;;  %4452 = vrcp.f32 %v1861_v26  ;;  %v1933_v40 = vadd.f32 1.0, %v4431_v58  ;;  %v3122_v61 = vmul.f32 %v2433_v24, %v2258_v0  ;;  %2592 = vperm.xlu1 %4099, %v5645_v60   ;;  %v2329_v60 = vld [vmem:[%s6691_s2 + $0x270] sm:$0xff]  ;;  %v3670_v26 = vmul.f32 -1.442695, %v5458_v8  ;;  %v6711_v24 = vld [vmem:[#allocation2_spill] sm:$0xff]  ;;  %v2332_v20 = vld [vmem:[%s6691_s2 + $0x288] sm:$0xff] }
 0x19a   :  { %v4435_v56 = vpop.eup %4434  ;;  %4454 = vrcp.f32 %v1934_v32  ;;  %v1864_v22 = vadd.f32 1.0, %v4433_v31  ;;  %v2428_v45 = vpop.permute.xlu0 %2427  ;;  %v3600_v32 = vmul.f32 -1.442695, %v5464_v39  ;;  %v2331_v39 = vld [vmem:[%s6691_s2 + $0x280] sm:$0xff] }
 0x19b   :  { %v4437_v42 = vpop.eup %4436  ;;  %4456 = vrcp.f32 %v1933_v40  ;;  %v1863_v1 = vadd.f32 1.0, %v4435_v56  ;;  %v3121_v14 = vmul.f32 %v2428_v45, %v2257_v46  ;;  %2587 = vperm.xlu0 %4098, %v5648_v23   ;;  %3266 = vst.msk [vmem:[%s6692_s3 + $0x38] sm:$0xff] %vm165_vm0, %v3122_v61  ;;  %v3673_v56 = vmul.f32 -1.442695, %v6711_v24  ;;  %v6712_v45 = vld [vmem:[#allocation3_spill] sm:$0xff] }
 0x19c   :  { %v4439_v54 = vpop.eup %4438  ;;  %4458 = vrcp.f32 %v1864_v22  ;;  %v1936_v29 = vadd.f32 1.0, %v4437_v42  ;;  %v2793_v23 = vpop.permute.xlu1 %2792  ;;  %v3672_v42 = vmul.f32 -1.442695, %v6712_v45 }
 0x19d   :  { %v4441_v2 = vpop.eup %4440  ;;  %4460 = vrcp.f32 %v1863_v1  ;;  %3265 = vst.msk [vmem:[%s6692_s3 + $0x30] sm:$0xff] %vm165_vm0, %v3121_v14  ;;  %v3194_v43 = vmul.f32 %v2793_v23, %v2330_v19  ;;  %2952 = vperm.xlu1 %4099, %v4439_v54   ;;  %v3603_v14 = vmul.f32 -1.442695, %v5468_v13  ;;  %v3602_v54 = vmul.f32 -1.442695, %v5472_v12 }
 0x19e   :  { %v4443_v25 = vpop.eup %4442  ;;  %4462 = vrcp.f32 %v1936_v29  ;;  %v2788_v15 = vpop.permute.xlu0 %2787 }
 0x19f   :  { %v4445_v28 = vpop.eup %4444  ;;  %4464 = vpow2.f32 %v3668_v50  ;;  %v3193_v34 = vmul.f32 %v2788_v15, %v2329_v60  ;;  %2947 = vperm.xlu0 %4098, %v4441_v2   ;;  %3338 = vst.msk [vmem:[%s6692_s3 + $0x278] sm:$0xff] %vm165_vm0, %v3194_v43  ;;  %v6713_v2 = vld [vmem:[#allocation4_spill] sm:$0xff]  ;;  %v3674_v43 = vmul.f32 -1.442695, %v5474_v7 }
 0x1a0   :  { %v4447_v0 = vpop.eup %4446  ;;  %4466 = vpow2.f32 %v3599_v33  ;;  %v2443_v8 = vpop.permute.xlu1 %2442  ;;  %v3675_v23 = vmul.f32 -1.442695, %v6713_v2  ;;  %v2261_v15 = vld [vmem:[%s6691_s2 + $0x50] sm:$0xff] }
 0x1a1   :  { %v4449_v58 = vpop.eup %4448  ;;  %3337 = vst.msk [vmem:[%s6692_s3 + $0x270] sm:$0xff] %vm165_vm0, %v3193_v34  ;;  %4468 = vpow2.f32 %v3598_v38  ;;  %v3124_v31 = vmul.f32 %v2443_v8, %v2260_v27  ;;  %2602 = vperm.xlu1 %4099, %v4443_v25   ;;  %v2262_v25 = vld [vmem:[%s6691_s2 + $0x58] sm:$0xff] }
 0x1a2   :  { %v4451_v46 = vpop.eup %4450  ;;  %4470 = vpow2.f32 %v3671_v48  ;;  %v2438_v40 = vpop.permute.xlu0 %2437 }
 0x1a3   :  { %v4453_v22 = vpop.eup %4452  ;;  %v3123_v61 = vmul.f32 %v2438_v40, %v2259_v63  ;;  %4472 = vpow2.f32 %v3670_v26  ;;  %2597 = vperm.xlu0 %4098, %v4445_v28   ;;  %3268 = vst.msk [vmem:[%s6692_s3 + $0x48] sm:$0xff] %vm165_vm0, %v3124_v31 }
 0x1a4   :  { %v4455_v1 = vpop.eup %4454  ;;  %4474 = vpow2.f32 %v3601_v44  ;;  %v2803_v19 = vpop.permute.xlu1 %2802 }
 0x1a5   :  { %v4457_v50 = vpop.eup %4456  ;;  %3267 = vst.msk [vmem:[%s6692_s3 + $0x40] sm:$0xff] %vm165_vm0, %v3123_v61  ;;  %4476 = vpow2.f32 %v3600_v32  ;;  %v3196_v60 = vmul.f32 %v2803_v19, %v2332_v20  ;;  %2962 = vperm.xlu1 %4099, %v4447_v0  }
 0x1a6   :  { %v5747_v29 = vpop.eup %4458  ;;  %v2798_v33 = vpop.permute.xlu0 %2797  ;;  %4478 = vpow2.f32 %v3673_v56 }
 0x1a7   :  { %v5750_v38 = vpop.eup %4460  ;;  %v3195_v13 = vmul.f32 %v2798_v33, %v2331_v39  ;;  %2957 = vperm.xlu0 %4098, %v4449_v58   ;;  %4480 = vpow2.f32 %v3672_v42  ;;  %3340 = vst.msk [vmem:[%s6692_s3 + $0x288] sm:$0xff] %vm165_vm0, %v3196_v60  ;;  %v2334_v58 = vld [vmem:[%s6691_s2 + $0x298] sm:$0xff] }
 0x1a8   :  { %v5756_v12 = vpop.eup %4462  ;;  %4482 = vpow2.f32 %v3603_v14  ;;  %v2453_v28 = vpop.permute.xlu1 %2452  ;;  %v2264_v14 = vld [vmem:[%s6691_s2 + $0x68] sm:$0xff] }
 0x1a9   :  { %v4465_v48 = vpop.eup %4464  ;;  %3339 = vst.msk [vmem:[%s6692_s3 + $0x280] sm:$0xff] %vm165_vm0, %v3195_v13  ;;  %4484 = vpow2.f32 %v3602_v54  ;;  %v3126_v27 = vmul.f32 %v2453_v28, %v2262_v25  ;;  %2612 = vperm.xlu1 %4099, %v4451_v46   ;;  %v2333_v46 = vld [vmem:[%s6691_s2 + $0x290] sm:$0xff]  ;;  %v2336_v28 = vld [vmem:[%s6691_s2 + $0x2a8] sm:$0xff] }
 0x1aa   :  { %v4467_v7 = vpop.eup %4466  ;;  %v1935_v34 = vadd.f32 1.0, %v4465_v48  ;;  %v2448_v26 = vpop.permute.xlu0 %2447  ;;  %4486 = vpow2.f32 %v3675_v23 }
 0x1ab   :  { %v4469_v0 = vpop.eup %4468  ;;  %v1866_v63 = vadd.f32 1.0, %v4467_v7  ;;  %v3125_v44 = vmul.f32 %v2448_v26, %v2261_v15  ;;  %2607 = vperm.xlu0 %4098, %v4453_v22   ;;  %4488 = vpow2.f32 %v3674_v43  ;;  %3270 = vst.msk [vmem:[%s6692_s3 + $0x58] sm:$0xff] %vm165_vm0, %v3126_v27 }
 0x1ac   :  { %v4471_v8 = vpop.eup %4470  ;;  %4490 = vrcp.f32 %v1935_v34  ;;  %v1865_v32 = vadd.f32 1.0, %v4469_v0  ;;  %v2813_v24 = vpop.permute.xlu1 %2812  ;;  %v3605_v0 = vmul.f32 -1.442695, %v5478_v9 }
 0x1ad   :  { %v4473_v31 = vpop.eup %4472  ;;  %4492 = vrcp.f32 %v1866_v63  ;;  %v1938_v40 = vadd.f32 1.0, %v4471_v8  ;;  %3269 = vst.msk [vmem:[%s6692_s3 + $0x50] sm:$0xff] %vm165_vm0, %v3125_v44  ;;  %v3198_v61 = vmul.f32 %v2813_v24, %v2334_v58  ;;  %2972 = vperm.xlu1 %4099, %v4455_v1   ;;  %v2263_v1 = vld [vmem:[%s6691_s2 + $0x60] sm:$0xff]  ;;  %v2266_v24 = vld [vmem:[%s6691_s2 + $0x78] sm:$0xff] }
 0x1ae   :  { %v4475_v56 = vpop.eup %4474  ;;  %4494 = vrcp.f32 %v1865_v32  ;;  %v1937_v22 = vadd.f32 1.0, %v4473_v31  ;;  %v2808_v20 = vpop.permute.xlu0 %2807  ;;  %v3604_v32 = vmul.f32 -1.442695, %v5483_v21  ;;  %v2265_v21 = vld [vmem:[%s6691_s2 + $0x70] sm:$0xff] }
 0x1af   :  { %v4477_v45 = vpop.eup %4476  ;;  %4496 = vrcp.f32 %v1938_v40  ;;  %v1868_v42 = vadd.f32 1.0, %v4475_v56  ;;  %v3197_v39 = vmul.f32 %v2808_v20, %v2333_v46  ;;  %2967 = vperm.xlu0 %4098, %v4457_v50   ;;  %3342 = vst.msk [vmem:[%s6692_s3 + $0x298] sm:$0xff] %vm165_vm0, %v3198_v61  ;;  %v3677_v40 = vmul.f32 -1.442695, %v5480_v62 }
 0x1b0   :  { %v4479_v19 = vpop.eup %4478  ;;  %4498 = vrcp.f32 %v1937_v22  ;;  %v1867_v54 = vadd.f32 1.0, %v4477_v45  ;;  %v2463_v50 = vpop.permute.xlu1 %2462  ;;  %v3607_v61 = vmul.f32 -1.442695, %v5490_v57  ;;  %v6716_v57 = vld [vmem:[#allocation7_spill] sm:$0xff] }
 0x1b1   :  { %v4481_v60 = vpop.eup %4480  ;;  %4500 = vrcp.f32 %v1868_v42  ;;  %v1940_v33 = vadd.f32 1.0, %v4479_v19  ;;  %3341 = vst.msk [vmem:[%s6692_s3 + $0x290] sm:$0xff] %vm165_vm0, %v3197_v39  ;;  %v3128_v13 = vmul.f32 %v2463_v50, %v2264_v14  ;;  %2622 = vperm.xlu1 %4099, %v5747_v29   ;;  %v2335_v29 = vld [vmem:[%s6691_s2 + $0x2a0] sm:$0xff]  ;;  %v3606_v39 = vmul.f32 -1.442695, %v5495_v36  ;;  %v2337_v36 = vld [vmem:[%s6691_s2 + $0x2b0] sm:$0xff] }
 0x1b2   :  { %v4483_v2 = vpop.eup %4482  ;;  %4502 = vrcp.f32 %v1867_v54  ;;  %v1939_v23 = vadd.f32 1.0, %v4481_v60  ;;  %v2458_v25 = vpop.permute.xlu0 %2457  ;;  %v2338_v54 = vld [vmem:[%s6691_s2 + $0x2b8] sm:$0xff]  ;;  %v3678_v50 = vmul.f32 -1.442695, %v6716_v57 }
 0x1b3   :  { %v4485_v43 = vpop.eup %4484  ;;  %4504 = vrcp.f32 %v1940_v33  ;;  %v1870_v15 = vadd.f32 1.0, %v4483_v2  ;;  %v3127_v48 = vmul.f32 %v2458_v25, %v2263_v1  ;;  %2617 = vperm.xlu0 %4098, %v5750_v38   ;;  %3272 = vst.msk [vmem:[%s6692_s3 + $0x68] sm:$0xff] %vm165_vm0, %v3128_v13  ;;  %v6715_v1 = vld [vmem:[#allocation6_spill] sm:$0xff]  ;;  %v3609_v13 = vmul.f32 -1.442695, %v5502_v55 }
 0x1b4   :  { %v4487_v7 = vpop.eup %4486  ;;  %4506 = vrcp.f32 %v1939_v23  ;;  %v1869_v34 = vadd.f32 1.0, %v4485_v43  ;;  %v2823_v38 = vpop.permute.xlu1 %2822  ;;  %v3679_v60 = vmul.f32 -1.442695, %v6715_v1  ;;  %v2267_v55 = vld [vmem:[%s6691_s2 + $0x80] sm:$0xff] }
 0x1b5   :  { %v4489_v27 = vpop.eup %4488  ;;  %4508 = vrcp.f32 %v1870_v15  ;;  %v1942_v26 = vadd.f32 1.0, %v4487_v7  ;;  %3271 = vst.msk [vmem:[%s6692_s3 + $0x60] sm:$0xff] %vm165_vm0, %v3127_v48  ;;  %v3200_v58 = vmul.f32 %v2823_v38, %v2336_v28  ;;  %2982 = vperm.xlu1 %4099, %v5756_v12   ;;  %v6714_v12 = vld [vmem:[#allocation5_spill] sm:$0xff] }
 0x1b6   :  { %v4491_v63 = vpop.eup %4490  ;;  %4510 = vrcp.f32 %v1869_v34  ;;  %v1941_v44 = vadd.f32 1.0, %v4489_v27  ;;  %v2818_v8 = vpop.permute.xlu0 %2817  ;;  %v3676_v56 = vmul.f32 -1.442695, %v6714_v12  ;;  %v6717_v48 = vld [vmem:[#allocation9_spill] sm:$0xff]  ;;  %v6718_v27 = vld [vmem:[#allocation8_spill] sm:$0xff] }
 0x1b7   :  { %v4493_v46 = vpop.eup %4492  ;;  %4512 = vrcp.f32 %v1942_v26  ;;  %v3199_v31 = vmul.f32 %v2818_v8, %v2335_v29  ;;  %2977 = vperm.xlu0 %4098, %v4491_v63   ;;  %3344 = vst.msk [vmem:[%s6692_s3 + $0x2a8] sm:$0xff] %vm165_vm0, %v3200_v58  ;;  %v3608_v28 = vmul.f32 -1.442695, %v6717_v48  ;;  %v2268_v29 = vld [vmem:[%s6691_s2 + $0x88] sm:$0xff]  ;;  %v3681_v26 = vmul.f32 -1.442695, %v6718_v27 }
 0x1b8   :  { %v4495_v9 = vpop.eup %4494  ;;  %4514 = vrcp.f32 %v1941_v44  ;;  %v2473_v62 = vpop.permute.xlu1 %2472  ;;  %v3611_v8 = vmul.f32 -1.442695, %v5513_v37  ;;  %v2339_v37 = vld [vmem:[%s6691_s2 + $0x2c0] sm:$0xff] }
 0x1b9   :  { %v4497_v22 = vpop.eup %4496  ;;  %3343 = vst.msk [vmem:[%s6692_s3 + $0x2a0] sm:$0xff] %vm165_vm0, %v3199_v31  ;;  %4516 = vpow2.f32 %v3605_v0  ;;  %v3130_v45 = vmul.f32 %v2473_v62, %v2266_v24  ;;  %2632 = vperm.xlu1 %4099, %v4493_v46   ;;  %v6719_v0 = vld [vmem:[#allocation10_spill] sm:$0xff] }
 0x1ba   :  { %v4499_v20 = vpop.eup %4498  ;;  %4518 = vpow2.f32 %v3604_v32  ;;  %v2468_v42 = vpop.permute.xlu0 %2467  ;;  %v3680_v63 = vmul.f32 -1.442695, %v6719_v0 }
 0x1bb   :  { %v4501_v14 = vpop.eup %4500  ;;  %4520 = vpow2.f32 %v3677_v40  ;;  %v3129_v19 = vmul.f32 %v2468_v42, %v2265_v21  ;;  %2627 = vperm.xlu0 %4098, %v4495_v9   ;;  %3274 = vst.msk [vmem:[%s6692_s3 + $0x78] sm:$0xff] %vm165_vm0, %v3130_v45  ;;  %v2340_v9 = vld [vmem:[%s6691_s2 + $0x2c8] sm:$0xff] }
 0x1bc   :  { %v4503_v33 = vpop.eup %4502  ;;  %4522 = vpow2.f32 %v3676_v56  ;;  %v2833_v23 = vpop.permute.xlu1 %2832 }
 0x1bd   :  { %v4505_v2 = vpop.eup %4504  ;;  %3273 = vst.msk [vmem:[%s6692_s3 + $0x70] sm:$0xff] %vm165_vm0, %v3129_v19  ;;  %4524 = vpow2.f32 %v3607_v61  ;;  %v3202_v43 = vmul.f32 %v2833_v23, %v2338_v54  ;;  %2992 = vperm.xlu1 %4099, %v4497_v22   ;;  %v2270_v54 = vld [vmem:[%s6691_s2 + $0x98] sm:$0xff] }
 0x1be   :  { %v4507_v25 = vpop.eup %4506  ;;  %v2828_v15 = vpop.permute.xlu0 %2827  ;;  %4526 = vpow2.f32 %v3606_v39 }
 0x1bf   :  { %v4509_v7 = vpop.eup %4508  ;;  %v3201_v34 = vmul.f32 %v2828_v15, %v2337_v36  ;;  %2987 = vperm.xlu0 %4098, %v4499_v20   ;;  %4528 = vpow2.f32 %v3679_v60  ;;  %3346 = vst.msk [vmem:[%s6692_s3 + $0x2b8] sm:$0xff] %vm165_vm0, %v3202_v43 }
 0x1c0   :  { %v4511_v38 = vpop.eup %4510  ;;  %4530 = vpow2.f32 %v3678_v50  ;;  %v2483_v58 = vpop.permute.xlu1 %2482 }
 0x1c1   :  { %v5864_v44 = vpop.eup %4512  ;;  %3345 = vst.msk [vmem:[%s6692_s3 + $0x2b0] sm:$0xff] %vm165_vm0, %v3201_v34  ;;  %4532 = vpow2.f32 %v3609_v13  ;;  %v3132_v46 = vmul.f32 %v2483_v58, %v2268_v29  ;;  %2642 = vperm.xlu1 %4099, %v4501_v14  }
 0x1c2   :  { %v5871_v32 = vpop.eup %4514  ;;  %v2478_v31 = vpop.permute.xlu0 %2477  ;;  %4534 = vpow2.f32 %v3608_v28  ;;  %v2342_v28 = vld [vmem:[%s6691_s2 + $0x2d8] sm:$0xff] }
 0x1c3   :  { %v4517_v40 = vpop.eup %4516  ;;  %v3131_v24 = vmul.f32 %v2478_v31, %v2267_v55  ;;  %2637 = vperm.xlu0 %4098, %v4503_v33   ;;  %4536 = vpow2.f32 %v3681_v26  ;;  %3276 = vst.msk [vmem:[%s6692_s3 + $0x88] sm:$0xff] %vm165_vm0, %v3132_v46  ;;  %v2269_v33 = vld [vmem:[%s6691_s2 + $0x90] sm:$0xff] }
 0x1c4   :  { %v4519_v21 = vpop.eup %4518  ;;  %v1872_v12 = vadd.f32 1.0, %v4517_v40  ;;  %4538 = vpow2.f32 %v3680_v63  ;;  %v2843_v62 = vpop.permute.xlu1 %2842  ;;  %v6720_v40 = vld [vmem:[#allocation12_spill] sm:$0xff] }
 0x1c5   :  { %v4521_v56 = vpop.eup %4520  ;;  %v1871_v22 = vadd.f32 1.0, %v4519_v21  ;;  %3275 = vst.msk [vmem:[%s6692_s3 + $0x80] sm:$0xff] %vm165_vm0, %v3131_v24  ;;  %4540 = vpow2.f32 %v3611_v8  ;;  %v3204_v45 = vmul.f32 %v2843_v62, %v2340_v9  ;;  %3002 = vperm.xlu1 %4099, %v4505_v2   ;;  %v3610_v24 = vmul.f32 -1.442695, %v6720_v40  ;;  %v2272_v9 = vld [vmem:[%s6691_s2 + $0xa8] sm:$0xff]  ;;  %v6722_v62 = vld [vmem:[#allocation13_spill] sm:$0xff] }
 0x1c6   :  { %v4523_v61 = vpop.eup %4522  ;;  %4542 = vrcp.f32 %v1872_v12  ;;  %v1944_v20 = vadd.f32 1.0, %v4521_v56  ;;  %v2838_v42 = vpop.permute.xlu0 %2837  ;;  %v6721_v12 = vld [vmem:[#allocation11_spill] sm:$0xff]  ;;  %v3617_v40 = vmul.f32 -1.442695, %v5538_v53 }
 0x1c7   :  { %v4525_v39 = vpop.eup %4524  ;;  %4544 = vrcp.f32 %v1871_v22  ;;  %v1943_v14 = vadd.f32 1.0, %v4523_v61  ;;  %v3203_v19 = vmul.f32 %v2838_v42, %v2339_v37  ;;  %2997 = vperm.xlu0 %4098, %v4507_v25   ;;  %3348 = vst.msk [vmem:[%s6692_s3 + $0x2c8] sm:$0xff] %vm165_vm0, %v3204_v45  ;;  %v3683_v37 = vmul.f32 -1.442695, %v6721_v12 }
 0x1c8   :  { %v4527_v1 = vpop.eup %4526  ;;  %4546 = vrcp.f32 %v1944_v20  ;;  %v1874_v60 = vadd.f32 1.0, %v4525_v39  ;;  %v2493_v50 = vpop.permute.xlu1 %2492  ;;  %v3682_v61 = vmul.f32 -1.442695, %v6722_v62  ;;  %v3613_v39 = vmul.f32 -1.442695, %v5521_v18  ;;  %v2343_v18 = vld [vmem:[%s6691_s2 + $0x2e0] sm:$0xff] }
 0x1c9   :  { %v4529_v36 = vpop.eup %4528  ;;  %4548 = vrcp.f32 %v1943_v14  ;;  %v1873_v57 = vadd.f32 1.0, %v4527_v1  ;;  %3347 = vst.msk [vmem:[%s6692_s3 + $0x2c0] sm:$0xff] %vm165_vm0, %v3203_v19  ;;  %v3134_v13 = vmul.f32 %v2493_v50, %v2270_v54  ;;  %2652 = vperm.xlu1 %4099, %v4509_v7   ;;  %v2341_v7 = vld [vmem:[%s6691_s2 + $0x2d0] sm:$0xff]  ;;  %v2344_v54 = vld [vmem:[%s6691_s2 + $0x2e8] sm:$0xff]  ;;  %v3612_v1 = vmul.f32 -1.442695, %v5525_v3 }
 0x1ca   :  { %v4531_v2 = vpop.eup %4530  ;;  %4550 = vrcp.f32 %v1874_v60  ;;  %v1946_v23 = vadd.f32 1.0, %v4529_v36  ;;  %v2488_v25 = vpop.permute.xlu0 %2487  ;;  %v6724_v50 = vld [vmem:[#allocation15_spill] sm:$0xff] }
 0x1cb   :  { %v4533_v43 = vpop.eup %4532  ;;  %4552 = vrcp.f32 %v1873_v57  ;;  %v1945_v15 = vadd.f32 1.0, %v4531_v2  ;;  %v3133_v48 = vmul.f32 %v2488_v25, %v2269_v33  ;;  %2647 = vperm.xlu0 %4098, %v4511_v38   ;;  %3278 = vst.msk [vmem:[%s6692_s3 + $0x98] sm:$0xff] %vm165_vm0, %v3134_v13  ;;  %v6723_v33 = vld [vmem:[#allocation14_spill] sm:$0xff]  ;;  %v3684_v2 = vmul.f32 -1.442695, %v6724_v50 }
 0x1cc   :  { %v4535_v34 = vpop.eup %4534  ;;  %4554 = vrcp.f32 %v1946_v23  ;;  %v1876_v29 = vadd.f32 1.0, %v4533_v43  ;;  %v2853_v38 = vpop.permute.xlu1 %2852  ;;  %v3685_v36 = vmul.f32 -1.442695, %v6723_v33  ;;  %v3615_v43 = vmul.f32 -1.442695, %v5529_v10  ;;  %v2273_v10 = vld [vmem:[%s6691_s2 + $0xb0] sm:$0xff] }
 0x1cd   :  { %v4537_v27 = vpop.eup %4536  ;;  %4556 = vrcp.f32 %v1945_v15  ;;  %v1875_v26 = vadd.f32 1.0, %v4535_v34  ;;  %3277 = vst.msk [vmem:[%s6692_s3 + $0x90] sm:$0xff] %vm165_vm0, %v3133_v48  ;;  %v3206_v63 = vmul.f32 %v2853_v38, %v2342_v28  ;;  %3012 = vperm.xlu1 %4099, %v5864_v44   ;;  %v2274_v28 = vld [vmem:[%s6691_s2 + $0xb8] sm:$0xff]  ;;  %v3614_v34 = vmul.f32 -1.442695, %v5531_v11 }
 0x1ce   :  { %v4539_v55 = vpop.eup %4538  ;;  %4558 = vrcp.f32 %v1876_v29  ;;  %v1948_v0 = vadd.f32 1.0, %v4537_v27  ;;  %v2848_v58 = vpop.permute.xlu0 %2847  ;;  %v6726_v38 = vld [vmem:[#allocation17_spill] sm:$0xff] }
 0x1cf   :  { %v4541_v8 = vpop.eup %4540  ;;  %4560 = vrcp.f32 %v1875_v26  ;;  %v1947_v46 = vadd.f32 1.0, %v4539_v55  ;;  %v3205_v31 = vmul.f32 %v2848_v58, %v2341_v7  ;;  %3007 = vperm.xlu0 %4098, %v5871_v32   ;;  %3350 = vst.msk [vmem:[%s6692_s3 + $0x2d8] sm:$0xff] %vm165_vm0, %v3206_v63  ;;  %v2271_v32 = vld [vmem:[%s6691_s2 + $0xa0] sm:$0xff]  ;;  %v6725_v7 = vld [vmem:[#allocation16_spill] sm:$0xff]  ;;  %v3686_v55 = vmul.f32 -1.442695, %v6726_v38 }
 0x1d0   :  { %v4543_v21 = vpop.eup %4542  ;;  %4562 = vrcp.f32 %v1948_v0  ;;  %v1878_v44 = vadd.f32 1.0, %v4541_v8  ;;  %v2503_v22 = vpop.permute.xlu1 %2502  ;;  %v3687_v27 = vmul.f32 -1.442695, %v6725_v7 }
 0x1d1   :  { %v4545_v56 = vpop.eup %4544  ;;  %4564 = vrcp.f32 %v1947_v46  ;;  %3349 = vst.msk [vmem:[%s6692_s3 + $0x2d0] sm:$0xff] %vm165_vm0, %v3205_v31  ;;  %v3136_v45 = vmul.f32 %v2503_v22, %v2272_v9  ;;  %2662 = vperm.xlu1 %4099, %v4543_v21   ;;  %v2346_v31 = vld [vmem:[%s6691_s2 + $0x2f8] sm:$0xff]  ;;  %v2345_v9 = vld [vmem:[%s6691_s2 + $0x2f0] sm:$0xff] }
 0x1d2   :  { %v4547_v20 = vpop.eup %4546  ;;  %4566 = vrcp.f32 %v1878_v44  ;;  %v2498_v42 = vpop.permute.xlu0 %2497 }
 0x1d3   :  { %v4549_v14 = vpop.eup %4548  ;;  %4568 = vpow2.f32 %v3610_v24  ;;  %v3135_v19 = vmul.f32 %v2498_v42, %v2271_v32  ;;  %2657 = vperm.xlu0 %4098, %v4545_v56   ;;  %3280 = vst.msk [vmem:[%s6692_s3 + $0xa8] sm:$0xff] %vm165_vm0, %v3136_v45  ;;  %v2275_v42 = vld [vmem:[%s6691_s2 + $0xc0] sm:$0xff] }
 0x1d4   :  { %v4551_v60 = vpop.eup %4550  ;;  %4570 = vpow2.f32 %v3683_v37  ;;  %v2863_v3 = vpop.permute.xlu1 %2862 }
 0x1d5   :  { %v4553_v57 = vpop.eup %4552  ;;  %3279 = vst.msk [vmem:[%s6692_s3 + $0xa0] sm:$0xff] %vm165_vm0, %v3135_v19  ;;  %4572 = vpow2.f32 %v3682_v61  ;;  %v3208_v13 = vmul.f32 %v2863_v3, %v2344_v54  ;;  %3022 = vperm.xlu1 %4099, %v4547_v20   ;;  %v2276_v61 = vld [vmem:[%s6691_s2 + $0xc8] sm:$0xff] }
 0x1d6   :  { %v4555_v23 = vpop.eup %4554  ;;  %v2858_v25 = vpop.permute.xlu0 %2857  ;;  %4574 = vpow2.f32 %v3613_v39  ;;  %v3616_v39 = vmul.f32 -1.442695, %v5541_v49  ;;  %v2348_v49 = vld [vmem:[%s6691_s2 + $0x308] sm:$0xff] }
 0x1d7   :  { %v4557_v15 = vpop.eup %4556  ;;  %v3207_v48 = vmul.f32 %v2858_v25, %v2343_v18  ;;  %3017 = vperm.xlu0 %4098, %v4549_v14   ;;  %4576 = vpow2.f32 %v3612_v1  ;;  %3352 = vst.msk [vmem:[%s6692_s3 + $0x2e8] sm:$0xff] %vm165_vm0, %v3208_v13 }
 0x1d8   :  { %v4559_v29 = vpop.eup %4558  ;;  %4578 = vpow2.f32 %v3685_v36  ;;  %v2513_v11 = vpop.permute.xlu1 %2512 }
 0x1d9   :  { %v4561_v26 = vpop.eup %4560  ;;  %3351 = vst.msk [vmem:[%s6692_s3 + $0x2e0] sm:$0xff] %vm165_vm0, %v3207_v48  ;;  %4580 = vpow2.f32 %v3684_v2  ;;  %v3138_v63 = vmul.f32 %v2513_v11, %v2274_v28  ;;  %2672 = vperm.xlu1 %4099, %v4551_v60   ;;  %v2277_v11 = vld [vmem:[%s6691_s2 + $0xd0] sm:$0xff] }
 0x1da   :  { %v5970_v0 = vpop.eup %4562  ;;  %v2508_v58 = vpop.permute.xlu0 %2507  ;;  %4582 = vpow2.f32 %v3615_v43 }
 0x1db   :  { %v5972_v8 = vpop.eup %4564  ;;  %v3137_v46 = vmul.f32 %v2508_v58, %v2273_v10  ;;  %2667 = vperm.xlu0 %4098, %v4553_v57   ;;  %4584 = vpow2.f32 %v3614_v34  ;;  %3282 = vst.msk [vmem:[%s6692_s3 + $0xb8] sm:$0xff] %vm165_vm0, %v3138_v63 }
 0x1dc   :  { %v5978_v24 = vpop.eup %4566  ;;  %4586 = vpow2.f32 %v3687_v27  ;;  %v2873_v44 = vpop.permute.xlu1 %2872  ;;  %v2278_v27 = vld [vmem:[%s6691_s2 + $0xd8] sm:$0xff] }
 0x1dd   :  { %v4569_v21 = vpop.eup %4568  ;;  %3281 = vst.msk [vmem:[%s6692_s3 + $0xb0] sm:$0xff] %vm165_vm0, %v3137_v46  ;;  %4588 = vpow2.f32 %v3686_v55  ;;  %v3210_v37 = vmul.f32 %v2873_v44, %v2346_v31  ;;  %3032 = vperm.xlu1 %4099, %v4555_v23   ;;  %v2347_v23 = vld [vmem:[%s6691_s2 + $0x300] sm:$0xff]  ;;  %v3689_v55 = vmul.f32 -1.442695, %v5546_v41  ;;  %v3688_v46 = vmul.f32 -1.442695, %v5549_v17 }
 0x1de   :  { %v4571_v53 = vpop.eup %4570  ;;  %v1877_v12 = vadd.f32 1.0, %v4569_v21  ;;  %v2868_v32 = vpop.permute.xlu0 %2867  ;;  %4590 = vpow2.f32 %v3617_v40  ;;  %v3619_v21 = vmul.f32 -1.442695, %v5554_v5  ;;  %v2349_v17 = vld [vmem:[%s6691_s2 + $0x310] sm:$0xff]  ;;  %v3691_v44 = vmul.f32 -1.442695, %v5562_v51 }
 0x1df   :  { %v4573_v56 = vpop.eup %4572  ;;  %v1950_v22 = vadd.f32 1.0, %v4571_v53  ;;  %v3209_v62 = vmul.f32 %v2868_v32, %v2345_v9  ;;  %3027 = vperm.xlu0 %4098, %v4557_v15   ;;  %3354 = vst.msk [vmem:[%s6692_s3 + $0x2f8] sm:$0xff] %vm165_vm0, %v3210_v37  ;;  %v2350_v9 = vld [vmem:[%s6691_s2 + $0x318] sm:$0xff]  ;;  %v3690_v32 = vmul.f32 -1.442695, %v5566_v6  ;;  %v2279_v51 = vld [vmem:[%s6691_s2 + $0xe0] sm:$0xff] }
 0x1e0   :  { %v4575_v20 = vpop.eup %4574  ;;  %4592 = vrcp.f32 %v1877_v12  ;;  %v1949_v45 = vadd.f32 1.0, %v4573_v56  ;;  %v2523_v54 = vpop.permute.xlu1 %2522  ;;  %v3621_v6 = vmul.f32 -1.442695, %v5568_v30  ;;  %v2352_v30 = vld [vmem:[%s6691_s2 + $0x328] sm:$0xff] }
 0x1e1   :  { %v4577_v14 = vpop.eup %4576  ;;  %4594 = vrcp.f32 %v1950_v22  ;;  %v1880_v19 = vadd.f32 1.0, %v4575_v20  ;;  %3353 = vst.msk [vmem:[%s6692_s3 + $0x2f0] sm:$0xff] %vm165_vm0, %v3209_v62  ;;  %v3140_v18 = vmul.f32 %v2523_v54, %v2276_v61  ;;  %2682 = vperm.xlu1 %4099, %v4559_v29  }
 0x1e2   :  { %v4579_v1 = vpop.eup %4578  ;;  %4596 = vrcp.f32 %v1949_v45  ;;  %v1879_v60 = vadd.f32 1.0, %v4577_v14  ;;  %v2518_v33 = vpop.permute.xlu0 %2517 }
 0x1e3   :  { %v4581_v36 = vpop.eup %4580  ;;  %v1952_v57 = vadd.f32 1.0, %v4579_v1  ;;  %v3139_v3 = vmul.f32 %v2518_v33, %v2275_v42  ;;  %2677 = vperm.xlu0 %4098, %v4561_v26   ;;  %3284 = vst.msk [vmem:[%s6692_s3 + $0xc8] sm:$0xff] %vm165_vm0, %v3140_v18  ;;  %4598 = vpow2.f32 %v3616_v39  ;;  %v3620_v42 = vmul.f32 -1.442695, %v5570_v35  ;;  %v6727_v18 = vld [vmem:[#allocation18_spill] sm:$0xff] }
 0x1e4   :  { %v4583_v50 = vpop.eup %4582  ;;  %v1951_v2 = vadd.f32 1.0, %v4581_v36  ;;  %4600 = vrcp.f32 %v1880_v19  ;;  %v2883_v43 = vpop.permute.xlu1 %2882  ;;  %v3693_v33 = vmul.f32 -1.442695, %v6727_v18  ;;  %v2351_v35 = vld [vmem:[%s6691_s2 + $0x320] sm:$0xff] }
 0x1e5   :  { %v4585_v13 = vpop.eup %4584  ;;  %v1882_v25 = vadd.f32 1.0, %v4583_v50  ;;  %3283 = vst.msk [vmem:[%s6692_s3 + $0xc0] sm:$0xff] %vm165_vm0, %v3139_v3  ;;  %4602 = vrcp.f32 %v1879_v60  ;;  %v3212_v28 = vmul.f32 %v2883_v43, %v2348_v49  ;;  %3042 = vperm.xlu1 %4099, %v5970_v0  }
 0x1e6   :  { %v4587_v15 = vpop.eup %4586  ;;  %v1881_v48 = vadd.f32 1.0, %v4585_v13  ;;  %v2878_v34 = vpop.permute.xlu0 %2877  ;;  %4604 = vrcp.f32 %v1952_v57  ;;  %v6728_v57 = vld [vmem:[#allocation19_spill] sm:$0xff] }
 0x1e7   :  { %v4589_v29 = vpop.eup %4588  ;;  %v1954_v10 = vadd.f32 1.0, %v4587_v15  ;;  %v3211_v7 = vmul.f32 %v2878_v34, %v2347_v23  ;;  %3037 = vperm.xlu0 %4098, %v5972_v8   ;;  %4606 = vrcp.f32 %v1951_v2  ;;  %3356 = vst.msk [vmem:[%s6692_s3 + $0x308] sm:$0xff] %vm165_vm0, %v3212_v28  ;;  %v3692_v3 = vmul.f32 -1.442695, %v6728_v57 }
 0x1e8   :  { %v1953_v26 = vadd.f32 1.0, %v4589_v29  ;;  %v4591_v38 = vpop.eup %4590  ;;  %4608 = vrcp.f32 %v1882_v25  ;;  %v2533_v0 = vpop.permute.xlu1 %2532  ;;  %v3623_v2 = vmul.f32 -1.442695, %v5582_v52  ;;  %v2281_v52 = vld [vmem:[%s6691_s2 + $0xf0] sm:$0xff]  ;;  %v3622_v29 = vmul.f32 -1.442695, %v5584_v4 }
 0x1e9   :  { %3355 = vst.msk [vmem:[%s6692_s3 + $0x300] sm:$0xff] %vm165_vm0, %v3211_v7  ;;  %4610 = vrcp.f32 %v1881_v48  ;;  %v3142_v58 = vmul.f32 %v2533_v0, %v2278_v27  ;;  %2692 = vperm.xlu1 %4099, %v5978_v24   ;;  %v3618_v24 = vmul.f32 -1.442695, %v5557_v16  ;;  %v1884_v22 = vadd.f32 1.0, %v4591_v38  ;;  %v2280_v16 = vld [vmem:[%s6691_s2 + $0xe8] sm:$0xff]  ;;  %v2282_v48 = vld [vmem:[%s6691_s2 + $0xf8] sm:$0xff] }
 0x1ea   :  { %v4593_v63 = vpop.eup %4592  ;;  %v2528_v8 = vpop.permute.xlu0 %2527  ;;  %4612 = vrcp.f32 %v1954_v10  ;;  %v2354_v4 = vld [vmem:[%s6691_s2 + $0x338] sm:$0xff] }
 0x1eb   :  { %v4595_v31 = vpop.eup %4594  ;;  %v3141_v40 = vmul.f32 %v2528_v8, %v2277_v11  ;;  %2687 = vperm.xlu0 %4098, %v4593_v63   ;;  %4614 = vrcp.f32 %v1953_v26  ;;  %3286 = vst.msk [vmem:[%s6692_s3 + $0xd8] sm:$0xff] %vm165_vm0, %v3142_v58 }
 0x1ec   :  { %v4597_v41 = vpop.eup %4596  ;;  %4616 = vpow2.f32 %v3689_v55  ;;  %v2893_v5 = vpop.permute.xlu1 %2892 }
 0x1ed   :  { %3285 = vst.msk [vmem:[%s6692_s3 + $0xd0] sm:$0xff] %vm165_vm0, %v3141_v40  ;;  %v4599_v53 = vpop.eup %4598  ;;  %4618 = vpow2.f32 %v3688_v46  ;;  %v3214_v12 = vmul.f32 %v2893_v5, %v2350_v9  ;;  %3052 = vperm.xlu1 %4099, %v4595_v31   ;;  %v2353_v46 = vld [vmem:[%s6691_s2 + $0x330] sm:$0xff]  ;;  %v3695_v31 = vmul.f32 -1.442695, %v5600_v59  ;;  %v2284_v59 = vld [vmem:[%s6691_s2 + $0x108] sm:$0xff] }
 0x1ee   :  { %v2888_v37 = vpop.permute.xlu0 %2887  ;;  %v4601_v56 = vpop.eup %4600  ;;  %4620 = vpow2.f32 %v3619_v21  ;;  %v1883_v14 = vadd.f32 1.0, %v4599_v53 }
 0x1ef   :  { %v3213_v62 = vmul.f32 %v2888_v37, %v2349_v17  ;;  %3047 = vperm.xlu0 %4098, %v4597_v41   ;;  %v4603_v61 = vpop.eup %4602  ;;  %3358 = vst.msk [vmem:[%s6692_s3 + $0x318] sm:$0xff] %vm165_vm0, %v3214_v12  ;;  %4622 = vpow2.f32 %v3618_v24  ;;  %v2283_v37 = vld [vmem:[%s6691_s2 + $0x100] sm:$0xff] }
 0x1f0   :  { %v4605_v20 = vpop.eup %4604  ;;  %4624 = vpow2.f32 %v3691_v44  ;;  %v2543_v45 = vpop.permute.xlu1 %2542 }
 0x1f1   :  { %3357 = vst.msk [vmem:[%s6692_s3 + $0x310] sm:$0xff] %vm165_vm0, %v3213_v62  ;;  %v4607_v39 = vpop.eup %4606  ;;  %v3144_v19 = vmul.f32 %v2543_v45, %v2280_v16  ;;  %4626 = vpow2.f32 %v3690_v32  ;;  %2702 = vperm.xlu1 %4099, %v4601_v56   ;;  %v3694_v45 = vmul.f32 -1.442695, %v5607_v47 }
 0x1f2   :  { %v2538_v54 = vpop.permute.xlu0 %2537  ;;  %v4609_v1 = vpop.eup %4608  ;;  %4628 = vrcp.f32 %v1884_v22 }
 0x1f3   :  { %v3143_v60 = vmul.f32 %v2538_v54, %v2279_v51  ;;  %2697 = vperm.xlu0 %4098, %v4603_v61   ;;  %v4611_v36 = vpop.eup %4610  ;;  %3288 = vst.msk [vmem:[%s6692_s3 + $0xe8] sm:$0xff] %vm165_vm0, %v3144_v19  ;;  %4630 = vpow2.f32 %v3621_v6 }
 0x1f4   :  { %v4613_v49 = vpop.eup %4612  ;;  %v2903_v50 = vpop.permute.xlu1 %2902  ;;  %4632 = vpow2.f32 %v3620_v42  ;;  %v2356_v42 = vld [vmem:[%s6691_s2 + $0x348] sm:$0xff] }
 0x1f5   :  { %3287 = vst.msk [vmem:[%s6692_s3 + $0xe0] sm:$0xff] %vm165_vm0, %v3143_v60  ;;  %v4615_v23 = vpop.eup %4614  ;;  %4634 = vrcp.f32 %v1883_v14  ;;  %v3216_v13 = vmul.f32 %v2903_v50, %v2352_v30  ;;  %3062 = vperm.xlu1 %4099, %v4605_v20   ;;  %v2355_v14 = vld [vmem:[%s6691_s2 + $0x340] sm:$0xff] }
 0x1f6   :  { %v2898_v25 = vpop.permute.xlu0 %2897  ;;  %v4617_v43 = vpop.eup %4616  ;;  %4636 = vpow2.f32 %v3693_v33 }
 0x1f7   :  { %v3215_v15 = vmul.f32 %v2898_v25, %v2351_v35  ;;  %3057 = vperm.xlu0 %4098, %v4607_v39   ;;  %v4619_v28 = vpop.eup %4618  ;;  %v1956_v34 = vadd.f32 1.0, %v4617_v43  ;;  %3360 = vst.msk [vmem:[%s6692_s3 + $0x328] sm:$0xff] %vm165_vm0, %v3216_v13  ;;  %4638 = vpow2.f32 %v3692_v3  ;;  %v2286_v35 = vld [vmem:[%s6691_s2 + $0x118] sm:$0xff]  ;;  %v2285_v3 = vld [vmem:[%s6691_s2 + $0x110] sm:$0xff] }
 0x1f8   :  { %v4621_v10 = vpop.eup %4620  ;;  %v1955_v7 = vadd.f32 1.0, %v4619_v28  ;;  %v2553_v27 = vpop.permute.xlu1 %2552  ;;  %4640 = vpow2.f32 %v3623_v2 }
 0x1f9   :  { %3359 = vst.msk [vmem:[%s6692_s3 + $0x320] sm:$0xff] %vm165_vm0, %v3215_v15  ;;  %v4623_v26 = vpop.eup %4622  ;;  %4642 = vrcp.f32 %v1956_v34  ;;  %v1886_v11 = vadd.f32 1.0, %v4621_v10  ;;  %v3146_v38 = vmul.f32 %v2553_v27, %v2282_v48  ;;  %2712 = vperm.xlu1 %4099, %v4609_v1   ;;  %v2358_v48 = vld [vmem:[%s6691_s2 + $0x358] sm:$0xff]  ;;  %v2357_v34 = vld [vmem:[%s6691_s2 + $0x350] sm:$0xff] }
 0x1fa   :  { %v2548_v55 = vpop.permute.xlu0 %2547  ;;  %v4625_v0 = vpop.eup %4624  ;;  %4644 = vrcp.f32 %v1955_v7  ;;  %v1885_v63 = vadd.f32 1.0, %v4623_v26 }
 0x1fb   :  { %v3145_v58 = vmul.f32 %v2548_v55, %v2281_v52  ;;  %2707 = vperm.xlu0 %4098, %v4611_v36   ;;  %v4627_v8 = vpop.eup %4626  ;;  %3290 = vst.msk [vmem:[%s6692_s3 + $0xf8] sm:$0xff] %vm165_vm0, %v3146_v38  ;;  %4646 = vpow2.f32 %v3622_v29  ;;  %v1958_v9 = vadd.f32 1.0, %v4625_v0  ;;  %v2287_v55 = vld [vmem:[%s6691_s2 + $0x120] sm:$0xff] }
 0x1fc   :  { %v4629_v40 = vpop.eup %4628  ;;  %4648 = vrcp.f32 %v1886_v11  ;;  %v2913_v21 = vpop.permute.xlu1 %2912  ;;  %v1957_v17 = vadd.f32 1.0, %v4627_v8  ;;  %v2288_v11 = vld [vmem:[%s6691_s2 + $0x128] sm:$0xff] }
 0x1fd   :  { %3289 = vst.msk [vmem:[%s6692_s3 + $0xf0] sm:$0xff] %vm165_vm0, %v3145_v58  ;;  %v4631_v41 = vpop.eup %4630  ;;  %4650 = vrcp.f32 %v1885_v63  ;;  %v3218_v24 = vmul.f32 %v2913_v21, %v2354_v4  ;;  %3072 = vperm.xlu1 %4099, %v4613_v49   ;;  %v2359_v21 = vld [vmem:[%s6691_s2 + $0x360] sm:$0xff] }
 0x1fe   :  { %v2908_v5 = vpop.permute.xlu0 %2907  ;;  %v4633_v44 = vpop.eup %4632  ;;  %4652 = vpow2.f32 %v3695_v31  ;;  %v1888_v56 = vadd.f32 1.0, %v4631_v41 }
 0x1ff   :  { %v3217_v53 = vmul.f32 %v2908_v5, %v2353_v46  ;;  %3067 = vperm.xlu0 %4098, %v4615_v23   ;;  %v4635_v12 = vpop.eup %4634  ;;  %3362 = vst.msk [vmem:[%s6692_s3 + $0x338] sm:$0xff] %vm165_vm0, %v3218_v24  ;;  %4654 = vrcp.f32 %v1958_v9  ;;  %v1887_v16 = vadd.f32 1.0, %v4633_v44 }
 0x200   :  { %v4637_v32 = vpop.eup %4636  ;;  %v2563_v22 = vpop.permute.xlu1 %2562  ;;  %4656 = vrcp.f32 %v1957_v17 }
 0x201   :  { %3361 = vst.msk [vmem:[%s6692_s3 + $0x330] sm:$0xff] %vm165_vm0, %v3217_v53  ;;  %v4639_v62 = vpop.eup %4638  ;;  %v3148_v61 = vmul.f32 %v2563_v22, %v2284_v59  ;;  %2722 = vperm.xlu1 %4099, %v4629_v40   ;;  %4658 = vrcp.f32 %v1888_v56  ;;  %v1960_v54 = vadd.f32 1.0, %v4637_v32  ;;  %v2360_v40 = vld [vmem:[%s6691_s2 + $0x368] sm:$0xff]  ;;  %v2290_v53 = vld [vmem:[%s6691_s2 + $0x138] sm:$0xff] }
 0x202   :  { %v2558_v51 = vpop.permute.xlu0 %2557  ;;  %v4641_v6 = vpop.eup %4640  ;;  %4660 = vrcp.f32 %v1887_v16  ;;  %v1959_v60 = vadd.f32 1.0, %v4639_v62  ;;  %v2362_v16 = vld [vmem:[%s6691_s2 + $0x378] sm:$0xff] }
 0x203   :  { %v3147_v20 = vmul.f32 %v2558_v51, %v2283_v37  ;;  %2717 = vperm.xlu0 %4098, %v4635_v12   ;;  %v4643_v39 = vpop.eup %4642  ;;  %3292 = vst.msk [vmem:[%s6692_s3 + $0x108] sm:$0xff] %vm165_vm0, %v3148_v61  ;;  %4662 = vpow2.f32 %v3694_v45  ;;  %v1890_v49 = vadd.f32 1.0, %v4641_v6  ;;  %v2289_v12 = vld [vmem:[%s6691_s2 + $0x130] sm:$0xff] }
 0x204   :  { %v4645_v19 = vpop.eup %4644  ;;  %v2923_v47 = vpop.permute.xlu1 %2922  ;;  %4664 = vrcp.f32 %v1960_v54  ;;  %v2361_v61 = vld [vmem:[%s6691_s2 + $0x370] sm:$0xff] }
 0x205   :  { %3291 = vst.msk [vmem:[%s6692_s3 + $0x100] sm:$0xff] %vm165_vm0, %v3147_v20  ;;  %v4647_v1 = vpop.eup %4646  ;;  %v3220_v30 = vmul.f32 %v2923_v47, %v2356_v42  ;;  %3082 = vperm.xlu1 %4099, %v4643_v39   ;;  %4666 = vrcp.f32 %v1959_v60  ;;  %v2292_v39 = vld [vmem:[%s6691_s2 + $0x148] sm:$0xff] }
 0x206   :  { %v2918_v18 = vpop.permute.xlu0 %2917  ;;  %v4649_v33 = vpop.eup %4648  ;;  %v1889_v23 = vadd.f32 1.0, %v4647_v1  ;;  %4668 = vrcp.f32 %v1890_v49  ;;  %v2364_v60 = vld [vmem:[%s6691_s2 + $0x388] sm:$0xff] }
 0x207   :  { %v3219_v36 = vmul.f32 %v2918_v18, %v2355_v14  ;;  %3077 = vperm.xlu0 %4098, %v4645_v19   ;;  %v4651_v57 = vpop.eup %4650  ;;  %3364 = vst.msk [vmem:[%s6692_s3 + $0x348] sm:$0xff] %vm165_vm0, %v3220_v30  ;;  %v2291_v14 = vld [vmem:[%s6691_s2 + $0x140] sm:$0xff] }
 0x208   :  { %v2573_v50 = vpop.permute.xlu1 %2572  ;;  %v4653_v2 = vpop.eup %4652  ;;  %4670 = vrcp.f32 %v1889_v23  ;;  %v2363_v30 = vld [vmem:[%s6691_s2 + $0x380] sm:$0xff] }
 0x209   :  { %3363 = vst.msk [vmem:[%s6692_s3 + $0x340] sm:$0xff] %vm165_vm0, %v3219_v36  ;;  %v3150_v13 = vmul.f32 %v2573_v50, %v2286_v35  ;;  %2732 = vperm.xlu1 %4099, %v4649_v33   ;;  %v4655_v43 = vpop.eup %4654  ;;  %v1962_v52 = vadd.f32 1.0, %v4653_v2 }
 0x20a   :  { %v2568_v25 = vpop.permute.xlu0 %2567  ;;  %v4657_v28 = vpop.eup %4656 }
 0x20b   :  { %v3149_v15 = vmul.f32 %v2568_v25, %v2285_v3  ;;  %2727 = vperm.xlu0 %4098, %v4651_v57   ;;  %3294 = vst.msk [vmem:[%s6692_s3 + $0x118] sm:$0xff] %vm165_vm0, %v3150_v13  ;;  %v4659_v27 = vpop.eup %4658  ;;  %4672 = vrcp.f32 %v1962_v52  ;;  %v2294_v57 = vld [vmem:[%s6691_s2 + $0x158] sm:$0xff]  ;;  %v2293_v3 = vld [vmem:[%s6691_s2 + $0x150] sm:$0xff]  ;;  %v2295_v52 = vld [vmem:[%s6691_s2 + $0x160] sm:$0xff] }
 0x20c   :  { %v2933_v29 = vpop.permute.xlu1 %2932  ;;  %v4661_v38 = vpop.eup %4660  ;;  %v2366_v13 = vld [vmem:[%s6691_s2 + $0x398] sm:$0xff]  ;;  %v2365_v25 = vld [vmem:[%s6691_s2 + $0x390] sm:$0xff] }
 0x20d   :  { %3293 = vst.msk [vmem:[%s6692_s3 + $0x110] sm:$0xff] %vm165_vm0, %v3149_v15  ;;  %v3222_v10 = vmul.f32 %v2933_v29, %v2358_v48  ;;  %3092 = vperm.xlu1 %4099, %v4655_v43   ;;  %v4663_v0 = vpop.eup %4662 }
 0x20e   :  { %v2928_v7 = vpop.permute.xlu0 %2927  ;;  %v1961_v58 = vadd.f32 1.0, %v4663_v0  ;;  %v4665_v46 = vpop.eup %4664 }
 0x20f   :  { %v3221_v26 = vmul.f32 %v2928_v7, %v2357_v34  ;;  %3087 = vperm.xlu0 %4098, %v4657_v28   ;;  %3366 = vst.msk [vmem:[%s6692_s3 + $0x358] sm:$0xff] %vm165_vm0, %v3222_v10  ;;  %v4667_v9 = vpop.eup %4666  ;;  %v2296_v34 = vld [vmem:[%s6691_s2 + $0x168] sm:$0xff] }
 0x210   :  { %v2583_v63 = vpop.permute.xlu1 %2582  ;;  %4674 = vrcp.f32 %v1961_v58  ;;  %v4669_v5 = vpop.eup %4668  ;;  %v2298_v58 = vld [vmem:[%s6691_s2 + $0x178] sm:$0xff] }
 0x211   :  { %3365 = vst.msk [vmem:[%s6692_s3 + $0x350] sm:$0xff] %vm165_vm0, %v3221_v26  ;;  %v3152_v4 = vmul.f32 %v2583_v63, %v2288_v11  ;;  %2742 = vperm.xlu1 %4099, %v4659_v27   ;;  %v2368_v26 = vld [vmem:[%s6691_s2 + $0x3a8] sm:$0xff]  ;;  %v2367_v11 = vld [vmem:[%s6691_s2 + $0x3a0] sm:$0xff] }
 0x212   :  { %v2578_v8 = vpop.permute.xlu0 %2577  ;;  %v4671_v59 = vpop.eup %4670 }
 0x213   :  { %v3151_v31 = vmul.f32 %v2578_v8, %v2287_v55  ;;  %2737 = vperm.xlu0 %4098, %v4661_v38   ;;  %3296 = vst.msk [vmem:[%s6692_s3 + $0x128] sm:$0xff] %vm165_vm0, %v3152_v4  ;;  %v2297_v4 = vld [vmem:[%s6691_s2 + $0x170] sm:$0xff] }
 0x214   :  { %v2943_v41 = vpop.permute.xlu1 %2942 }
 0x215   :  { %3295 = vst.msk [vmem:[%s6692_s3 + $0x120] sm:$0xff] %vm165_vm0, %v3151_v31  ;;  %v3224_v17 = vmul.f32 %v2943_v41, %v2360_v40  ;;  %3102 = vperm.xlu1 %4099, %v4665_v46   ;;  %v4673_v22 = vpop.eup %4672 }
 0x216   :  { %v2938_v24 = vpop.permute.xlu0 %2937 }
 0x217   :  { %v3223_v44 = vmul.f32 %v2938_v24, %v2359_v21  ;;  %3097 = vperm.xlu0 %4098, %v4667_v9   ;;  %3368 = vst.msk [vmem:[%s6692_s3 + $0x368] sm:$0xff] %vm165_vm0, %v3224_v17  ;;  %v2370_v9 = vld [vmem:[%s6691_s2 + $0x3b8] sm:$0xff]  ;;  %v2369_v21 = vld [vmem:[%s6691_s2 + $0x3b0] sm:$0xff] }
 0x218   :  { %v2593_v37 = vpop.permute.xlu1 %2592 }
 0x219   :  { %3367 = vst.msk [vmem:[%s6692_s3 + $0x360] sm:$0xff] %vm165_vm0, %v3223_v44  ;;  %v3154_v32 = vmul.f32 %v2593_v37, %v2290_v53  ;;  %2752 = vperm.xlu1 %4099, %v4669_v5   ;;  %v2300_v44 = vld [vmem:[%s6691_s2 + $0x188] sm:$0xff]  ;;  %v2299_v53 = vld [vmem:[%s6691_s2 + $0x180] sm:$0xff] }
 0x21a   :  { %v2588_v56 = vpop.permute.xlu0 %2587  ;;  %v4675_v6 = vpop.eup %4674 }
 0x21b   :  { %v3153_v62 = vmul.f32 %v2588_v56, %v2289_v12  ;;  %2747 = vperm.xlu0 %4098, %v4671_v59   ;;  %3298 = vst.msk [vmem:[%s6692_s3 + $0x138] sm:$0xff] %vm165_vm0, %v3154_v32  ;;  %v2372_v56 = vld [vmem:[%s6691_s2 + $0x3c8] sm:$0xff] }
 0x21c   :  { %v2953_v51 = vpop.permute.xlu1 %2952 }
 0x21d   :  { %3297 = vst.msk [vmem:[%s6692_s3 + $0x130] sm:$0xff] %vm165_vm0, %v3153_v62  ;;  %v3226_v20 = vmul.f32 %v2953_v51, %v2362_v16  ;;  %3112 = vperm.xlu1 %4099, %v4673_v22   ;;  %v2371_v22 = vld [vmem:[%s6691_s2 + $0x3c0] sm:$0xff] }
 0x21e   :  { %v2948_v45 = vpop.permute.xlu0 %2947 }
 0x21f   :  { %v3225_v42 = vmul.f32 %v2948_v45, %v2361_v61  ;;  %3107 = vperm.xlu0 %4098, %v4675_v6   ;;  %3370 = vst.msk [vmem:[%s6692_s3 + $0x378] sm:$0xff] %vm165_vm0, %v3226_v20  ;;  %v2302_v6 = vld [vmem:[%s6691_s2 + $0x198] sm:$0xff]  ;;  %v2301_v20 = vld [vmem:[%s6691_s2 + $0x190] sm:$0xff] }
 0x220   :  { %v2603_v19 = vpop.permute.xlu1 %2602 }
 0x221   :  { %3369 = vst.msk [vmem:[%s6692_s3 + $0x370] sm:$0xff] %vm165_vm0, %v3225_v42  ;;  %v3156_v54 = vmul.f32 %v2603_v19, %v2292_v39  ;;  %v2374_v19 = vld [vmem:[%s6691_s2 + $0x3d8] sm:$0xff] }
 0x222   :  { %v2598_v47 = vpop.permute.xlu0 %2597 }
 0x223   :  { %v3155_v1 = vmul.f32 %v2598_v47, %v2291_v14  ;;  %3300 = vst.msk [vmem:[%s6692_s3 + $0x148] sm:$0xff] %vm165_vm0, %v3156_v54  ;;  %v2373_v54 = vld [vmem:[%s6691_s2 + $0x3d0] sm:$0xff] }
 0x224   :  { %v2963_v18 = vpop.permute.xlu1 %2962 }
 0x225   :  { %3299 = vst.msk [vmem:[%s6692_s3 + $0x140] sm:$0xff] %vm165_vm0, %v3155_v1  ;;  %v3228_v33 = vmul.f32 %v2963_v18, %v2364_v60  ;;  %v2304_v18 = vld [vmem:[%s6691_s2 + $0x1a8] sm:$0xff] }
 0x226   :  { %v2958_v36 = vpop.permute.xlu0 %2957 }
 0x227   :  { %v3227_v35 = vmul.f32 %v2958_v36, %v2363_v30  ;;  %3372 = vst.msk [vmem:[%s6692_s3 + $0x388] sm:$0xff] %vm165_vm0, %v3228_v33  ;;  %v2303_v33 = vld [vmem:[%s6691_s2 + $0x1a0] sm:$0xff] }
 0x228   :  { %v2613_v49 = vpop.permute.xlu1 %2612 }
 0x229   :  { %3371 = vst.msk [vmem:[%s6692_s3 + $0x380] sm:$0xff] %vm165_vm0, %v3227_v35  ;;  %v3158_v50 = vmul.f32 %v2613_v49, %v2294_v57  ;;  %v2376_v49 = vld [vmem:[%s6691_s2 + $0x3e8] sm:$0xff] }
 0x22a   :  { %v2608_v2 = vpop.permute.xlu0 %2607 }
 0x22b   :  { %v3157_v23 = vmul.f32 %v2608_v2, %v2293_v3  ;;  %3302 = vst.msk [vmem:[%s6692_s3 + $0x158] sm:$0xff] %vm165_vm0, %v3158_v50  ;;  %v2375_v50 = vld [vmem:[%s6691_s2 + $0x3e0] sm:$0xff] }
 0x22c   :  { %v2973_v43 = vpop.permute.xlu1 %2972 }
 0x22d   :  { %3301 = vst.msk [vmem:[%s6692_s3 + $0x150] sm:$0xff] %vm165_vm0, %v3157_v23  ;;  %v3230_v15 = vmul.f32 %v2973_v43, %v2366_v13  ;;  %v2306_v43 = vld [vmem:[%s6691_s2 + $0x1b8] sm:$0xff] }
 0x22e   :  { %v2968_v48 = vpop.permute.xlu0 %2967 }
 0x22f   :  { %v3229_v28 = vmul.f32 %v2968_v48, %v2365_v25  ;;  %3374 = vst.msk [vmem:[%s6692_s3 + $0x398] sm:$0xff] %vm165_vm0, %v3230_v15  ;;  %v2305_v15 = vld [vmem:[%s6691_s2 + $0x1b0] sm:$0xff] }
 0x230   :  { %v2623_v29 = vpop.permute.xlu1 %2622 }
 0x231   :  { %3373 = vst.msk [vmem:[%s6692_s3 + $0x390] sm:$0xff] %vm165_vm0, %v3229_v28  ;;  %v3160_v10 = vmul.f32 %v2623_v29, %v2296_v34  ;;  %v2378_v29 = vld [vmem:[%s6691_s2 + $0x3f8] sm:$0xff] }
 0x232   :  { %v2618_v7 = vpop.permute.xlu0 %2617 }
 0x233   :  { %v3159_v27 = vmul.f32 %v2618_v7, %v2295_v52  ;;  %3304 = vst.msk [vmem:[%s6692_s3 + $0x168] sm:$0xff] %vm165_vm0, %v3160_v10  ;;  %v2377_v10 = vld [vmem:[%s6691_s2 + $0x3f0] sm:$0xff] }
 0x234   :  { %v2983_v38 = vpop.permute.xlu1 %2982 }
 0x235   :  { %3303 = vst.msk [vmem:[%s6692_s3 + $0x160] sm:$0xff] %vm165_vm0, %v3159_v27  ;;  %v3232_v55 = vmul.f32 %v2983_v38, %v2368_v26  ;;  %v2308_v38 = vld [vmem:[%s6691_s2 + $0x1c8] sm:$0xff] }
 0x236   :  { %v2978_v0 = vpop.permute.xlu0 %2977 }
 0x237   :  { %v3231_v63 = vmul.f32 %v2978_v0, %v2367_v11  ;;  %3376 = vst.msk [vmem:[%s6692_s3 + $0x3a8] sm:$0xff] %vm165_vm0, %v3232_v55  ;;  %v2307_v55 = vld [vmem:[%s6691_s2 + $0x1c0] sm:$0xff] }
 0x238   :  { %v2633_v8 = vpop.permute.xlu1 %2632 }
 0x239   :  { %3375 = vst.msk [vmem:[%s6692_s3 + $0x3a0] sm:$0xff] %vm165_vm0, %v3231_v63  ;;  %v3162_v46 = vmul.f32 %v2633_v8, %v2298_v58  ;;  %v2380_v8 = vld [vmem:[%s6691_s2 + $0x408] sm:$0xff] }
 0x23a   :  { %v2628_v31 = vpop.permute.xlu0 %2627 }
 0x23b   :  { %v3161_v40 = vmul.f32 %v2628_v31, %v2297_v4  ;;  %3306 = vst.msk [vmem:[%s6692_s3 + $0x178] sm:$0xff] %vm165_vm0, %v3162_v46  ;;  %v2379_v46 = vld [vmem:[%s6691_s2 + $0x400] sm:$0xff] }
 0x23c   :  { %v2993_v41 = vpop.permute.xlu1 %2992 }
 0x23d   :  { %3305 = vst.msk [vmem:[%s6692_s3 + $0x170] sm:$0xff] %vm165_vm0, %v3161_v40  ;;  %v3234_v17 = vmul.f32 %v2993_v41, %v2370_v9  ;;  %v2310_v41 = vld [vmem:[%s6691_s2 + $0x1d8] sm:$0xff] }
 0x23e   :  { %v2988_v24 = vpop.permute.xlu0 %2987 }
 0x23f   :  { %v3233_v5 = vmul.f32 %v2988_v24, %v2369_v21  ;;  %3378 = vst.msk [vmem:[%s6692_s3 + $0x3b8] sm:$0xff] %vm165_vm0, %v3234_v17  ;;  %v2309_v17 = vld [vmem:[%s6691_s2 + $0x1d0] sm:$0xff] }
 0x240   :  { %v2643_v59 = vpop.permute.xlu1 %2642 }
 0x241   :  { %3377 = vst.msk [vmem:[%s6692_s3 + $0x3b0] sm:$0xff] %vm165_vm0, %v3233_v5  ;;  %v3164_v12 = vmul.f32 %v2643_v59, %v2300_v44  ;;  %v2382_v59 = vld [vmem:[%s6691_s2 + $0x418] sm:$0xff] }
 0x242   :  { %v2638_v37 = vpop.permute.xlu0 %2637 }
 0x243   :  { %v3163_v32 = vmul.f32 %v2638_v37, %v2299_v53  ;;  %3308 = vst.msk [vmem:[%s6692_s3 + $0x188] sm:$0xff] %vm165_vm0, %v3164_v12  ;;  %v2381_v12 = vld [vmem:[%s6691_s2 + $0x410] sm:$0xff] }
 0x244   :  { %v3003_v62 = vpop.permute.xlu1 %3002 }
 0x245   :  { %3307 = vst.msk [vmem:[%s6692_s3 + $0x180] sm:$0xff] %vm165_vm0, %v3163_v32  ;;  %v3236_v16 = vmul.f32 %v3003_v62, %v2372_v56  ;;  %v2312_v62 = vld [vmem:[%s6691_s2 + $0x1e8] sm:$0xff] }
 0x246   :  { %v2998_v61 = vpop.permute.xlu0 %2997 }
 0x247   :  { %v3235_v51 = vmul.f32 %v2998_v61, %v2371_v22  ;;  %3380 = vst.msk [vmem:[%s6692_s3 + $0x3c8] sm:$0xff] %vm165_vm0, %v3236_v16  ;;  %v2311_v16 = vld [vmem:[%s6691_s2 + $0x1e0] sm:$0xff] }
 0x248   :  { %v2653_v45 = vpop.permute.xlu1 %2652 }
 0x249   :  { %3379 = vst.msk [vmem:[%s6692_s3 + $0x3c0] sm:$0xff] %vm165_vm0, %v3235_v51  ;;  %v3166_v42 = vmul.f32 %v2653_v45, %v2302_v6  ;;  %v2384_v45 = vld [vmem:[%s6691_s2 + $0x428] sm:$0xff] }
 0x24a   :  { %v2648_v39 = vpop.permute.xlu0 %2647 }
 0x24b   :  { %v3165_v14 = vmul.f32 %v2648_v39, %v2301_v20  ;;  %3310 = vst.msk [vmem:[%s6692_s3 + $0x198] sm:$0xff] %vm165_vm0, %v3166_v42  ;;  %v2383_v42 = vld [vmem:[%s6691_s2 + $0x420] sm:$0xff] }
 0x24c   :  { %v3013_v47 = vpop.permute.xlu1 %3012 }
 0x24d   :  { %3309 = vst.msk [vmem:[%s6692_s3 + $0x190] sm:$0xff] %vm165_vm0, %v3165_v14  ;;  %v3238_v1 = vmul.f32 %v3013_v47, %v2374_v19  ;;  %v2314_v47 = vld [vmem:[%s6691_s2 + $0x1f8] sm:$0xff] }
 0x24e   :  { %v3008_v60 = vpop.permute.xlu0 %3007 }
 0x24f   :  { %v3237_v30 = vmul.f32 %v3008_v60, %v2373_v54  ;;  %3382 = vst.msk [vmem:[%s6692_s3 + $0x3d8] sm:$0xff] %vm165_vm0, %v3238_v1  ;;  %v2313_v1 = vld [vmem:[%s6691_s2 + $0x1f0] sm:$0xff] }
 0x250   :  { %v2663_v36 = vpop.permute.xlu1 %2662 }
 0x251   :  { %3381 = vst.msk [vmem:[%s6692_s3 + $0x3d0] sm:$0xff] %vm165_vm0, %v3237_v30  ;;  %v3168_v35 = vmul.f32 %v2663_v36, %v2304_v18  ;;  %v2386_v36 = vld [vmem:[%s6691_s2 + $0x438] sm:$0xff] }
 0x252   :  { %v2658_v57 = vpop.permute.xlu0 %2657 }
 0x253   :  { %v3167_v3 = vmul.f32 %v2658_v57, %v2303_v33  ;;  %3312 = vst.msk [vmem:[%s6692_s3 + $0x1a8] sm:$0xff] %vm165_vm0, %v3168_v35  ;;  %v2385_v35 = vld [vmem:[%s6691_s2 + $0x430] sm:$0xff] }
 0x254   :  { %v3023_v2 = vpop.permute.xlu1 %3022 }
 0x255   :  { %3311 = vst.msk [vmem:[%s6692_s3 + $0x1a0] sm:$0xff] %vm165_vm0, %v3167_v3  ;;  %v3240_v23 = vmul.f32 %v3023_v2, %v2376_v49  ;;  %v2316_v2 = vld [vmem:[%s6691_s2 + $0x208] sm:$0xff] }
 0x256   :  { %v3018_v13 = vpop.permute.xlu0 %3017 }
 0x257   :  { %v3239_v25 = vmul.f32 %v3018_v13, %v2375_v50  ;;  %3384 = vst.msk [vmem:[%s6692_s3 + $0x3e8] sm:$0xff] %vm165_vm0, %v3240_v23  ;;  %v2315_v23 = vld [vmem:[%s6691_s2 + $0x200] sm:$0xff] }
 0x258   :  { %v2673_v48 = vpop.permute.xlu1 %2672 }
 0x259   :  { %3383 = vst.msk [vmem:[%s6692_s3 + $0x3e0] sm:$0xff] %vm165_vm0, %v3239_v25  ;;  %v3170_v28 = vmul.f32 %v2673_v48, %v2306_v43  ;;  %v2388_v48 = vld [vmem:[%s6691_s2 + $0x448] sm:$0xff] }
 0x25a   :  { %v2668_v34 = vpop.permute.xlu0 %2667 }
 0x25b   :  { %v3169_v52 = vmul.f32 %v2668_v34, %v2305_v15  ;;  %3314 = vst.msk [vmem:[%s6692_s3 + $0x1b8] sm:$0xff] %vm165_vm0, %v3170_v28  ;;  %v2387_v28 = vld [vmem:[%s6691_s2 + $0x440] sm:$0xff] }
 0x25c   :  { %v3033_v7 = vpop.permute.xlu1 %3032 }
 0x25d   :  { %3313 = vst.msk [vmem:[%s6692_s3 + $0x1b0] sm:$0xff] %vm165_vm0, %v3169_v52  ;;  %v3242_v27 = vmul.f32 %v3033_v7, %v2378_v29  ;;  %v2318_v7 = vld [vmem:[%s6691_s2 + $0x218] sm:$0xff] }
 0x25e   :  { %v3028_v26 = vpop.permute.xlu0 %3027 }
 0x25f   :  { %v3241_v11 = vmul.f32 %v3028_v26, %v2377_v10  ;;  %3386 = vst.msk [vmem:[%s6692_s3 + $0x3f8] sm:$0xff] %vm165_vm0, %v3242_v27  ;;  %v2317_v27 = vld [vmem:[%s6691_s2 + $0x210] sm:$0xff] }
 0x260   :  { %v2683_v0 = vpop.permute.xlu1 %2682 }
 0x261   :  { %3385 = vst.msk [vmem:[%s6692_s3 + $0x3f0] sm:$0xff] %vm165_vm0, %v3241_v11  ;;  %v3172_v63 = vmul.f32 %v2683_v0, %v2308_v38  ;;  %v2390_v0 = vld [vmem:[%s6691_s2 + $0x458] sm:$0xff] }
 0x262   :  { %v2678_v58 = vpop.permute.xlu0 %2677 }
 0x263   :  { %v3171_v4 = vmul.f32 %v2678_v58, %v2307_v55  ;;  %3316 = vst.msk [vmem:[%s6692_s3 + $0x1c8] sm:$0xff] %vm165_vm0, %v3172_v63  ;;  %v2389_v63 = vld [vmem:[%s6691_s2 + $0x450] sm:$0xff] }
 0x264   :  { %v3043_v31 = vpop.permute.xlu1 %3042 }
 0x265   :  { %3315 = vst.msk [vmem:[%s6692_s3 + $0x1c0] sm:$0xff] %vm165_vm0, %v3171_v4  ;;  %v3244_v40 = vmul.f32 %v3043_v31, %v2380_v8  ;;  %v2320_v31 = vld [vmem:[%s6691_s2 + $0x228] sm:$0xff] }
 0x266   :  { %v3038_v9 = vpop.permute.xlu0 %3037 }
 0x267   :  { %v3243_v21 = vmul.f32 %v3038_v9, %v2379_v46  ;;  %3388 = vst.msk [vmem:[%s6692_s3 + $0x408] sm:$0xff] %vm165_vm0, %v3244_v40  ;;  %v2319_v40 = vld [vmem:[%s6691_s2 + $0x220] sm:$0xff] }
 0x268   :  { %v2693_v24 = vpop.permute.xlu1 %2692 }
 0x269   :  { %3387 = vst.msk [vmem:[%s6692_s3 + $0x400] sm:$0xff] %vm165_vm0, %v3243_v21  ;;  %v3174_v5 = vmul.f32 %v2693_v24, %v2310_v41  ;;  %v2392_v24 = vld [vmem:[%s6691_s2 + $0x468] sm:$0xff] }
 0x26a   :  { %v2688_v44 = vpop.permute.xlu0 %2687 }
 0x26b   :  { %v3173_v53 = vmul.f32 %v2688_v44, %v2309_v17  ;;  %3318 = vst.msk [vmem:[%s6692_s3 + $0x1d8] sm:$0xff] %vm165_vm0, %v3174_v5  ;;  %v2391_v5 = vld [vmem:[%s6691_s2 + $0x460] sm:$0xff] }
 0x26c   :  { %v3053_v37 = vpop.permute.xlu1 %3052 }
 0x26d   :  { %3317 = vst.msk [vmem:[%s6692_s3 + $0x1d0] sm:$0xff] %vm165_vm0, %v3173_v53  ;;  %v3246_v32 = vmul.f32 %v3053_v37, %v2382_v59  ;;  %v2322_v37 = vld [vmem:[%s6691_s2 + $0x238] sm:$0xff] }
 0x26e   :  { %v3048_v56 = vpop.permute.xlu0 %3047 }
 0x26f   :  { %v3245_v22 = vmul.f32 %v3048_v56, %v2381_v12  ;;  %3390 = vst.msk [vmem:[%s6692_s3 + $0x418] sm:$0xff] %vm165_vm0, %v3246_v32  ;;  %v2321_v32 = vld [vmem:[%s6691_s2 + $0x230] sm:$0xff] }
 0x270   :  { %v2703_v61 = vpop.permute.xlu1 %2702 }
 0x271   :  { %3389 = vst.msk [vmem:[%s6692_s3 + $0x410] sm:$0xff] %vm165_vm0, %v3245_v22  ;;  %v3176_v51 = vmul.f32 %v2703_v61, %v2312_v62  ;;  %v2394_v61 = vld [vmem:[%s6691_s2 + $0x478] sm:$0xff] }
 0x272   :  { %v2698_v6 = vpop.permute.xlu0 %2697 }
 0x273   :  { %v3175_v20 = vmul.f32 %v2698_v6, %v2311_v16  ;;  %3320 = vst.msk [vmem:[%s6692_s3 + $0x1e8] sm:$0xff] %vm165_vm0, %v3176_v51  ;;  %v2393_v51 = vld [vmem:[%s6691_s2 + $0x470] sm:$0xff] }
 0x274   :  { %v3063_v39 = vpop.permute.xlu1 %3062 }
 0x275   :  { %3319 = vst.msk [vmem:[%s6692_s3 + $0x1e0] sm:$0xff] %vm165_vm0, %v3175_v20  ;;  %v3248_v14 = vmul.f32 %v3063_v39, %v2384_v45 }
 0x276   :  { %v3058_v19 = vpop.permute.xlu0 %3057 }
 0x277   :  { %v3247_v54 = vmul.f32 %v3058_v19, %v2383_v42  ;;  %3392 = vst.msk [vmem:[%s6692_s3 + $0x428] sm:$0xff] %vm165_vm0, %v3248_v14 }
 0x278   :  { %v2713_v60 = vpop.permute.xlu1 %2712 }
 0x279   :  { %3391 = vst.msk [vmem:[%s6692_s3 + $0x420] sm:$0xff] %vm165_vm0, %v3247_v54  ;;  %v3178_v30 = vmul.f32 %v2713_v60, %v2314_v47 }
 0x27a   :  { %v2708_v18 = vpop.permute.xlu0 %2707 }
 0x27b   :  { %v3177_v33 = vmul.f32 %v2708_v18, %v2313_v1  ;;  %3322 = vst.msk [vmem:[%s6692_s3 + $0x1f8] sm:$0xff] %vm165_vm0, %v3178_v30 }
 0x27c   :  { %v3073_v57 = vpop.permute.xlu1 %3072 }
 0x27d   :  { %3321 = vst.msk [vmem:[%s6692_s3 + $0x1f0] sm:$0xff] %vm165_vm0, %v3177_v33  ;;  %v3250_v3 = vmul.f32 %v3073_v57, %v2386_v36 }
 0x27e   :  { %v3068_v49 = vpop.permute.xlu0 %3067 }
 0x27f   :  { %v3249_v50 = vmul.f32 %v3068_v49, %v2385_v35  ;;  %3394 = vst.msk [vmem:[%s6692_s3 + $0x438] sm:$0xff] %vm165_vm0, %v3250_v3 }
 0x280   :  { %v2723_v13 = vpop.permute.xlu1 %2722 }
 0x281   :  { %3393 = vst.msk [vmem:[%s6692_s3 + $0x430] sm:$0xff] %vm165_vm0, %v3249_v50  ;;  %v3180_v25 = vmul.f32 %v2723_v13, %v2316_v2 }
 0x282   :  { %v2718_v43 = vpop.permute.xlu0 %2717 }
 0x283   :  { %v3179_v15 = vmul.f32 %v2718_v43, %v2315_v23  ;;  %3324 = vst.msk [vmem:[%s6692_s3 + $0x208] sm:$0xff] %vm165_vm0, %v3180_v25 }
 0x284   :  { %v3083_v34 = vpop.permute.xlu1 %3082 }
 0x285   :  { %3323 = vst.msk [vmem:[%s6692_s3 + $0x200] sm:$0xff] %vm165_vm0, %v3179_v15  ;;  %v3252_v52 = vmul.f32 %v3083_v34, %v2388_v48 }
 0x286   :  { %v3078_v29 = vpop.permute.xlu0 %3077 }
 0x287   :  { %v3251_v10 = vmul.f32 %v3078_v29, %v2387_v28  ;;  %3396 = vst.msk [vmem:[%s6692_s3 + $0x448] sm:$0xff] %vm165_vm0, %v3252_v52 }
 0x288   :  { %v2733_v26 = vpop.permute.xlu1 %2732 }
 0x289   :  { %3395 = vst.msk [vmem:[%s6692_s3 + $0x440] sm:$0xff] %vm165_vm0, %v3251_v10  ;;  %v3182_v11 = vmul.f32 %v2733_v26, %v2318_v7 }
 0x28a   :  { %v2728_v38 = vpop.permute.xlu0 %2727 }
 0x28b   :  { %v3181_v55 = vmul.f32 %v2728_v38, %v2317_v27  ;;  %3326 = vst.msk [vmem:[%s6692_s3 + $0x218] sm:$0xff] %vm165_vm0, %v3182_v11 }
 0x28c   :  { %v3093_v58 = vpop.permute.xlu1 %3092 }
 0x28d   :  { %3325 = vst.msk [vmem:[%s6692_s3 + $0x210] sm:$0xff] %vm165_vm0, %v3181_v55  ;;  %v3254_v4 = vmul.f32 %v3093_v58, %v2390_v0 }
 0x28e   :  { %v3088_v8 = vpop.permute.xlu0 %3087 }
 0x28f   :  { %v3253_v46 = vmul.f32 %v3088_v8, %v2389_v63  ;;  %3398 = vst.msk [vmem:[%s6692_s3 + $0x458] sm:$0xff] %vm165_vm0, %v3254_v4 }
 0x290   :  { %v2743_v9 = vpop.permute.xlu1 %2742 }
 0x291   :  { %3397 = vst.msk [vmem:[%s6692_s3 + $0x450] sm:$0xff] %vm165_vm0, %v3253_v46  ;;  %v3184_v21 = vmul.f32 %v2743_v9, %v2320_v31 }
 0x292   :  { %v2738_v41 = vpop.permute.xlu0 %2737 }
 0x293   :  { %v3183_v17 = vmul.f32 %v2738_v41, %v2319_v40  ;;  %3328 = vst.msk [vmem:[%s6692_s3 + $0x228] sm:$0xff] %vm165_vm0, %v3184_v21 }
 0x294   :  { %v3103_v44 = vpop.permute.xlu1 %3102 }
 0x295   :  { %3327 = vst.msk [vmem:[%s6692_s3 + $0x220] sm:$0xff] %vm165_vm0, %v3183_v17  ;;  %v3256_v53 = vmul.f32 %v3103_v44, %v2392_v24 }
 0x296   :  { %v3098_v59 = vpop.permute.xlu0 %3097 }
 0x297   :  { %v3255_v12 = vmul.f32 %v3098_v59, %v2391_v5  ;;  %3400 = vst.msk [vmem:[%s6692_s3 + $0x468] sm:$0xff] %vm165_vm0, %v3256_v53 }
 0x298   :  { %v2753_v56 = vpop.permute.xlu1 %2752 }
 0x299   :  { %3399 = vst.msk [vmem:[%s6692_s3 + $0x460] sm:$0xff] %vm165_vm0, %v3255_v12  ;;  %v3186_v22 = vmul.f32 %v2753_v56, %v2322_v37 }
 0x29a   :  { %v2748_v62 = vpop.permute.xlu0 %2747 }
 0x29b   :  { %v3185_v16 = vmul.f32 %v2748_v62, %v2321_v32  ;;  %3330 = vst.msk [vmem:[%s6692_s3 + $0x238] sm:$0xff] %vm165_vm0, %v3186_v22 }
 0x29c   :  { %v3113_v6 = vpop.permute.xlu1 %3112 }
 0x29d   :  { %3329 = vst.msk [vmem:[%s6692_s3 + $0x230] sm:$0xff] %vm165_vm0, %v3185_v16  ;;  %v3258_v20 = vmul.f32 %v3113_v6, %v2394_v61 }
 0x29e   :  { %v3108_v45 = vpop.permute.xlu0 %3107 }
 0x29f   :  { %v3257_v42 = vmul.f32 %v3108_v45, %v2393_v51  ;;  %3402 = vst.msk [vmem:[%s6692_s3 + $0x478] sm:$0xff] %vm165_vm0, %v3258_v20 }
 0x2a1   :  { %3401 = vst.msk [vmem:[%s6692_s3 + $0x470] sm:$0xff] %vm165_vm0, %v3257_v42 }

</bundles_post_ra>
